<compile_context>
chip_gen: v7x
topology: tpu7x:2x2x1
jax: 0.10.0
libtpu: 0.0.40
codegen_flags: <defaults>
</compile_context>

<pallas_src>
import functools

import jax
import jax.numpy as jnp
from jax import lax
from jax.experimental import pallas as pl
from jax.experimental.pallas import tpu as pltpu

_INV_SQRT2 = 0.7071067811865476
_SQRT_2_OVER_PI = 0.7978845608028654


def _gelu(v, approx):
    if approx:
        # tanh approximation (EUP path); default remains the exact erf formulation.
        return 0.5 * v * (1.0 + jnp.tanh(_SQRT_2_OVER_PI * (v + 0.044715 * v * v * v)))
    return 0.5 * v * (1.0 + lax.erf(v * _INV_SQRT2))


def mixer_kernel(x_ref,
                 w1a_ref, b1a_ref, w1b_ref, b1b_ref,
                 w2at_ref, b2a_ref, ln_g_ref, ln_b_ref, w2bt_ref, b2b_ref,
                 o_ref, *, approx_gelu):
    TB, L, C = x_ref.shape

    # ---- mlp1: channel mixing fused over all TB*L rows (one MXU matmul pair) ----
    xf = x_ref[...].reshape(TB * L, C)                       # [TB*L, C] (f32 or bf16 stream)
    h = jnp.dot(xf.astype(w1a_ref.dtype), w1a_ref[...],
                preferred_element_type=jnp.float32) + b1a_ref[...]
    h = _gelu(h, approx_gelu)
    h = jnp.dot(h.astype(w1b_ref.dtype), w1b_ref[...],
                preferred_element_type=jnp.float32) + b1b_ref[...]
    y = xf.astype(jnp.float32) + h                           # residual in f32, [TB*L, C]

    # ---- rearrange to the token-mixing layout [L, TB*C] (small XLU transposes) ----
    # [TB*L, C] -> [TB, L, C] -> [TB, C, L] -> [TB*C, L] -> [L, TB*C]
    y_bcl = jnp.swapaxes(y.reshape(TB, L, C), 1, 2).reshape(TB * C, L)
    y_mix = y_bcl.T                                          # [L, TB*C] f32

    # ---- mlp2: token mixing fused across batch+channels (MXU output width TB*C) ----
    md = w2at_ref.dtype
    z = jnp.dot(w2at_ref[...], y_mix.astype(md),
                preferred_element_type=jnp.float32) + b2a_ref[...]       # [M2, TB*C]
    # LayerNorm over the hidden axis (rows); one column == one (batch, channel) pair.
    mean = jnp.mean(z, axis=0, keepdims=True)                            # [1, TB*C]
    var = jnp.maximum(jnp.mean(z * z, axis=0, keepdims=True) - mean * mean, 0.0)
    z = (z - mean) * lax.rsqrt(var + 1e-5)
    z = z * ln_g_ref[...] + ln_b_ref[...]
    z = _gelu(z, approx_gelu)                                            # [M2, TB*C]
    delta = jnp.dot(w2bt_ref[...], z.astype(md),
                    preferred_element_type=jnp.float32)                  # [L, TB*C]
    out_mix = y_mix + delta + b2b_ref[...]                               # [L, TB*C]

    # ---- back to [TB, L, C]; single store of the whole block ----
    out = jnp.swapaxes(out_mix.T.reshape(TB, C, L), 1, 2)                # [TB, L, C]
    # TODO(synk): lane-dense (TB, L*C) store skipped (needs sublane->lane merging reshape).
    o_ref[...] = out.astype(o_ref.dtype)


def _vmem_budget_bytes():
    """Generation-aware VMEM budget (leave headroom below physical capacity)."""
    cap = 64 << 20                                  # conservative default (v7x per-TC)
    try:
        cap = int(pltpu.get_tpu_info().vmem_capacity_bytes)
    except Exception:
        pass
    return max(16 << 20, min(int(cap * 0.8), cap - (12 << 20)))


def _pick_batch_tile(N, L, C, M1, M2, in_itemsize, out_itemsize, budget_bytes,
                     target_rows=512):
    """Largest TB that divides N, keeps >=2 grid steps when possible (megacore / 2 TCs),
    targets roughly `target_rows` fused mlp1 rows, and fits the VMEM budget."""
    if N <= 1:
        return 1
    per_b = (2 * L * C * (in_itemsize + out_itemsize)      # double-buffered in/out tiles
             + 4 * L * (2 * C + M1)                         # f32 mlp1 intermediates
             + 4 * C * (2 * M2 + 3 * L))                    # f32 mlp2 intermediates
    cap_vmem = max(1, int((budget_bytes // 2) // max(1, per_b)))
    cap_rows = max(1, target_rows // max(1, L))
    tb = max(1, min(N // 2, cap_vmem, cap_rows))
    while N % tb:
        tb -= 1
    return tb


def mlp_mixer_encoder_layer(x, params, *, use_bf16_matmul=False, approx_gelu=False,
                            batch_tile=None, core_parallel=False):
    """x: [N, L, C].  params: dict of weights stored as [in, out] (= PyTorch W.T)."""
    N, L, C = x.shape
    out_dtype = x.dtype
    wdt = jnp.bfloat16 if use_bf16_matmul else params["w1a"].dtype

    # Weight/bias pre-layout (plain XLA, outside the kernel): token-mixing weights
    # pre-transposed so every in-kernel dot is a plain [M,K]x[K,N] MXU matmul.
    w1a = params["w1a"].astype(wdt)                         # [C,  M1]
    w1b = params["w1b"].astype(wdt)                         # [M1, C ]
    w2at = params["w2a"].T.astype(wdt)                      # [M2, L ]
    w2bt = params["w2b"].T.astype(wdt)                      # [L,  M2]
    b1a = params["b1a"].reshape(1, -1).astype(jnp.float32)  # [1, M1]
    b1b = params["b1b"].reshape(1, -1).astype(jnp.float32)  # [1, C ]
    b2a = params["b2a"].reshape(-1, 1).astype(jnp.float32)  # [M2, 1]
    ln_g = params["ln_g"].reshape(-1, 1).astype(jnp.float32)
    ln_b = params["ln_b"].reshape(-1, 1).astype(jnp.float32)
    b2b = params["b2b"].reshape(-1, 1).astype(jnp.float32)  # [L, 1]

    M1 = w1a.shape[1]
    M2 = w2at.shape[0]
    assert w1a.shape == (C, M1) and w1b.shape == (M1, C)
    assert w2at.shape == (M2, L) and w2bt.shape == (L, M2)

    # bf16 activation stream halves HBM<->VMEM DMA bytes; compute stays f32 in-kernel.
    x_in = x.astype(jnp.bfloat16) if use_bf16_matmul else x

    budget = _vmem_budget_bytes()
    TB = batch_tile if batch_tile is not None else _pick_batch_tile(
        N, L, C, M1, M2, x_in.dtype.itemsize, jnp.dtype(out_dtype).itemsize, budget)
    assert N % TB == 0, "batch tile must divide N"
    grid = (N // TB,)

    consts = (w1a, b1a, w1b, b1b, w2at, b2a, ln_g, ln_b, w2bt, b2b)

    # VMEM limit: resident weights + double-buffered I/O tiles + live f32 intermediates,
    # clamped to the generation-aware budget (headroom below 64/128 MiB physical).
    wbytes = sum(int(a.size) * a.dtype.itemsize for a in consts)
    io_bytes = 2 * TB * L * C * (x_in.dtype.itemsize + jnp.dtype(out_dtype).itemsize)
    act_bytes = 8 * (TB * L * (2 * C + M1) + TB * C * (2 * M2 + 3 * L))
    vmem_limit = int(min(max(io_bytes + 2 * wbytes + act_bytes + (16 << 20), 32 << 20),
                         budget))

    sem = (pltpu.CORE_PARALLEL,) if core_parallel else ("parallel",)
    kern = functools.partial(mixer_kernel, approx_gelu=approx_gelu)

    def _call(single_buffer_consts):
        def const_spec(a):
            nd = a.ndim
            imap = lambda *i, _nd=nd: (0,) * _nd
            if single_buffer_consts:
                # Grid-invariant: double-buffering is pure VMEM waste.
                return pl.BlockSpec(a.shape, imap, pipeline_mode=pl.Buffered(1))
            return pl.BlockSpec(a.shape, imap)

        return pl.pallas_call(
            kern,
            out_shape=jax.ShapeDtypeStruct((N, L, C), out_dtype),
            grid_spec=pltpu.PrefetchScalarGridSpec(
                num_scalar_prefetch=0,
                grid=grid,
                in_specs=[pl.BlockSpec((TB, L, C), lambda i: (i, 0, 0))]
                         + [const_spec(a) for a in consts],
                out_specs=pl.BlockSpec((TB, L, C), lambda i: (i, 0, 0)),
            ),
            compiler_params=pltpu.CompilerParams(
                dimension_semantics=sem,
                vmem_limit_bytes=vmem_limit,
            ),
        )(x_in, *consts)

    try:
        return _call(True)
    except Exception:
        # pipeline_mode / pl.Buffered(1) unsupported on this jax build -> default buffering.
        return _call(False)


def reference_forward(x, params):
    """Pure-JAX reference mirroring the PyTorch forward exactly (f32)."""
    def gelu(v):
        return 0.5 * v * (1.0 + lax.erf(v / jnp.sqrt(2.0)))

    h = gelu(x @ params["w1a"] + params["b1a"]) @ params["w1b"] + params["b1b"]
    x = x + h
    xt = jnp.swapaxes(x, 1, 2)                               # [N, C, L]
    z = xt @ params["w2a"] + params["b2a"]
    mean = jnp.mean(z, axis=-1, keepdims=True)
    var = jnp.mean((z - mean) ** 2, axis=-1, keepdims=True)  # biased, as in nn.LayerNorm
    z = (z - mean) / jnp.sqrt(var + 1e-5)
    z = z * params["ln_g"] + params["ln_b"]
    z = gelu(z) @ params["w2b"] + params["b2b"]
    xt = xt + z
    return jnp.swapaxes(xt, 1, 2)                            # [N, L, C]


def make_params(key, dim1, dim2, factor=1):
    """Deterministic synthetic init.  Weights stored as [in, out] (= PyTorch W.T)."""
    ks = jax.random.split(key, 8)
    s1 = 1.0 / jnp.sqrt(dim1)
    s2 = 1.0 / jnp.sqrt(dim2)
    return {
        # mlp1: Linear(dim1, dim1*factor) -> GELU -> Linear(dim1*factor, dim1)
        "w1a": jax.random.normal(ks[0], (dim1, dim1 * factor), jnp.float32) * s1,
        "b1a": jax.random.normal(ks[1], (1, dim1 * factor), jnp.float32) * s1,
        "w1b": jax.random.normal(ks[2], (dim1 * factor, dim1), jnp.float32) * s1,
        "b1b": jax.random.normal(ks[3], (1, dim1), jnp.float32) * s1,
        # mlp2: Linear(dim2, dim2*factor) -> LayerNorm(dim2*factor) -> GELU -> Linear(dim2*factor, dim2)
        "w2a": jax.random.normal(ks[4], (dim2, dim2 * factor), jnp.float32) * s2,
        "b2a": jax.random.normal(ks[5], (1, dim2 * factor), jnp.float32) * s2,
        "ln_g": jnp.ones((1, dim2 * factor), jnp.float32),
        "ln_b": jnp.zeros((1, dim2 * factor), jnp.float32),
        "w2b": jax.random.normal(ks[6], (dim2 * factor, dim2), jnp.float32) * s2,
        "b2b": jax.random.normal(ks[7], (1, dim2), jnp.float32) * s2,
    }


if __name__ == "__main__":
    # x is [N, L, C]; dim1 = C (channel MLP), dim2 = L (token MLP).  N=8 exercises the
    # batch-tiled grid with >=2 parallel steps; factor=2 exercises non-square weights.
    N, L, C = 8, 16, 32
    factor = 2
    key = jax.random.PRNGKey(0)
    kx, kp = jax.random.split(key)

    x = jax.random.normal(kx, (N, L, C), jnp.float32)
    params = make_params(kp, dim1=C, dim2=L, factor=factor)

    ref = jax.block_until_ready(reference_forward(x, params))

    # f32 matmul path: tight tolerance against the reference.
    out = jax.block_until_ready(mlp_mixer_encoder_layer(x, params))
    assert out.shape == (N, L, C)
    assert jnp.allclose(out, ref, atol=1e-4, rtol=1e-4), "f32 kernel mismatch vs reference"

    # tanh-approx GELU path (EUP offload): small, bounded deviation from exact erf GELU.
    out_tanh = jax.block_until_ready(
        mlp_mixer_encoder_layer(x, params, approx_gelu=True))
    assert jnp.allclose(out_tanh, ref, atol=1e-1, rtol=1e-1), "tanh-GELU kernel mismatch"

    # bf16 path (v6e/v7x): bf16 weights AND bf16 activation I/O, f32 accumulation and
    # f32 GELU/LayerNorm in-kernel; validated against the f32 reference loosely.
    out_bf16 = jax.block_until_ready(
        mlp_mixer_encoder_layer(x, params, use_bf16_matmul=True))
    assert out_bf16.shape == (N, L, C)
    assert jnp.allclose(out_bf16, ref, atol=1.5e-1, rtol=1.5e-1), "bf16 kernel mismatch vs reference"

    print("KERNEL_OK")
</pallas_src>

<mosaic_0001>
module attributes {stable_mosaic.version = 11 : i64} {
  func.func @mixer_kernel(%arg0: i32, %arg1: memref<4x16x32xf32, #tpu.memory_space<vmem>>, %arg2: memref<32x64xf32, #tpu.memory_space<vmem>>, %arg3: memref<1x64xf32, #tpu.memory_space<vmem>>, %arg4: memref<64x32xf32, #tpu.memory_space<vmem>>, %arg5: memref<1x32xf32, #tpu.memory_space<vmem>>, %arg6: memref<32x16xf32, #tpu.memory_space<vmem>>, %arg7: memref<32x1xf32, #tpu.memory_space<vmem>>, %arg8: memref<32x1xf32, #tpu.memory_space<vmem>>, %arg9: memref<32x1xf32, #tpu.memory_space<vmem>>, %arg10: memref<16x32xf32, #tpu.memory_space<vmem>>, %arg11: memref<16x1xf32, #tpu.memory_space<vmem>>, %arg12: memref<4x16x32xf32, #tpu.memory_space<vmem>>) attributes {dimension_semantics = [#tpu.dimension_semantics<parallel>], iteration_bounds = array<i64: 2>, scalar_prefetch = 0 : i64, scratch_operands = 0 : i64, tpu.core_type = #tpu.core_type<tc>, window_params = [{transform_indices = @transform_0, window_bounds = array<i64: 4, 16, 32>}, {pipeline_mode = #tpu.pipeline_mode<synchronous>, transform_indices = @transform_1, window_bounds = array<i64: 32, 64>}, {pipeline_mode = #tpu.pipeline_mode<synchronous>, transform_indices = @transform_2, window_bounds = array<i64: 1, 64>}, {pipeline_mode = #tpu.pipeline_mode<synchronous>, transform_indices = @transform_3, window_bounds = array<i64: 64, 32>}, {pipeline_mode = #tpu.pipeline_mode<synchronous>, transform_indices = @transform_4, window_bounds = array<i64: 1, 32>}, {pipeline_mode = #tpu.pipeline_mode<synchronous>, transform_indices = @transform_5, window_bounds = array<i64: 32, 16>}, {pipeline_mode = #tpu.pipeline_mode<synchronous>, transform_indices = @transform_6, window_bounds = array<i64: 32, 1>}, {pipeline_mode = #tpu.pipeline_mode<synchronous>, transform_indices = @transform_7, window_bounds = array<i64: 32, 1>}, {pipeline_mode = #tpu.pipeline_mode<synchronous>, transform_indices = @transform_8, window_bounds = array<i64: 32, 1>}, {pipeline_mode = #tpu.pipeline_mode<synchronous>, transform_indices = @transform_9, window_bounds = array<i64: 16, 32>}, {pipeline_mode = #tpu.pipeline_mode<synchronous>, transform_indices = @transform_10, window_bounds = array<i64: 16, 1>}, {transform_indices = @transform_11, window_bounds = array<i64: 4, 16, 32>}]} {
    %c0 = arith.constant 0 : index
    %c0_0 = arith.constant 0 : index
    %c0_1 = arith.constant 0 : index
    %0 = vector.load %arg1[%c0, %c0_0, %c0_1] : memref<4x16x32xf32, #tpu.memory_space<vmem>>, vector<4x16x32xf32>
    %1 = vector.shape_cast %0 : vector<4x16x32xf32> to vector<64x32xf32>
    %c0_2 = arith.constant 0 : index
    %c0_3 = arith.constant 0 : index
    %2 = vector.load %arg2[%c0_2, %c0_3] : memref<32x64xf32, #tpu.memory_space<vmem>>, vector<32x64xf32>
    %cst = arith.constant dense<0.000000e+00> : vector<64x64xf32>
    %3 = tpu.matmul %1, %2, %cst {dimension_numbers = #tpu.dot_dimension_numbers<[1], [0], [0], [1], [0, 0, 1, 1], [], []>} : vector<64x32xf32>, vector<32x64xf32>, vector<64x64xf32> -> vector<64x64xf32>
    %c0_4 = arith.constant 0 : index
    %c0_5 = arith.constant 0 : index
    %4 = vector.load %arg3[%c0_4, %c0_5] : memref<1x64xf32, #tpu.memory_space<vmem>>, vector<1x64xf32>
    %5 = vector.broadcast %4 : vector<1x64xf32> to vector<64x64xf32>
    %6 = arith.addf %3, %5 : vector<64x64xf32>
    %cst_6 = arith.constant 5.000000e-01 : f32
    %7 = vector.broadcast %cst_6 : f32 to vector<64x64xf32>
    %8 = arith.mulf %7, %6 : vector<64x64xf32>
    %cst_7 = arith.constant 0.707106769 : f32
    %9 = vector.broadcast %cst_7 : f32 to vector<64x64xf32>
    %10 = arith.mulf %6, %9 : vector<64x64xf32>
    %11 = math.erf %10 : vector<64x64xf32>
    %cst_8 = arith.constant 1.000000e+00 : f32
    %12 = vector.broadcast %cst_8 : f32 to vector<64x64xf32>
    %13 = arith.addf %12, %11 : vector<64x64xf32>
    %14 = arith.mulf %8, %13 : vector<64x64xf32>
    %c0_9 = arith.constant 0 : index
    %c0_10 = arith.constant 0 : index
    %15 = vector.load %arg4[%c0_9, %c0_10] : memref<64x32xf32, #tpu.memory_space<vmem>>, vector<64x32xf32>
    %cst_11 = arith.constant dense<0.000000e+00> : vector<64x32xf32>
    %16 = tpu.matmul %14, %15, %cst_11 {dimension_numbers = #tpu.dot_dimension_numbers<[1], [0], [0], [1], [0, 0, 1, 1], [], []>} : vector<64x64xf32>, vector<64x32xf32>, vector<64x32xf32> -> vector<64x32xf32>
    %c0_12 = arith.constant 0 : index
    %c0_13 = arith.constant 0 : index
    %17 = vector.load %arg5[%c0_12, %c0_13] : memref<1x32xf32, #tpu.memory_space<vmem>>, vector<1x32xf32>
    %18 = vector.broadcast %17 : vector<1x32xf32> to vector<64x32xf32>
    %19 = arith.addf %16, %18 : vector<64x32xf32>
    %20 = arith.addf %1, %19 : vector<64x32xf32>
    %21 = vector.shape_cast %20 : vector<64x32xf32> to vector<4x16x32xf32>
    %22 = tpu.transpose %21, [0, 2, 1] : vector<4x16x32xf32> -> vector<4x32x16xf32>
    %23 = vector.shape_cast %22 : vector<4x32x16xf32> to vector<128x16xf32>
    %24 = tpu.transpose %23, [1, 0] : vector<128x16xf32> -> vector<16x128xf32>
    %c0_14 = arith.constant 0 : index
    %c0_15 = arith.constant 0 : index
    %25 = vector.load %arg6[%c0_14, %c0_15] : memref<32x16xf32, #tpu.memory_space<vmem>>, vector<32x16xf32>
    %cst_16 = arith.constant dense<0.000000e+00> : vector<32x128xf32>
    %26 = tpu.matmul %25, %24, %cst_16 {dimension_numbers = #tpu.dot_dimension_numbers<[1], [0], [0], [1], [0, 0, 1, 1], [], []>} : vector<32x16xf32>, vector<16x128xf32>, vector<32x128xf32> -> vector<32x128xf32>
    %c0_17 = arith.constant 0 : index
    %c0_18 = arith.constant 0 : index
    %27 = vector.load %arg7[%c0_17, %c0_18] : memref<32x1xf32, #tpu.memory_space<vmem>>, vector<32x1xf32>
    %28 = vector.broadcast %27 : vector<32x1xf32> to vector<32x128xf32>
    %29 = arith.addf %26, %28 : vector<32x128xf32>
    %cst_19 = arith.constant dense<0.000000e+00> : vector<128xf32>
    %30 = vector.multi_reduction <add>, %29, %cst_19 [0] : vector<32x128xf32> to vector<128xf32>
    %31 = vector.shape_cast %30 : vector<128xf32> to vector<1x128xf32>
    %cst_20 = arith.constant 3.200000e+01 : f32
    %32 = vector.broadcast %cst_20 : f32 to vector<1x128xf32>
    %33 = arith.divf %31, %32 : vector<1x128xf32>
    %34 = arith.mulf %29, %29 : vector<32x128xf32>
    %cst_21 = arith.constant dense<0.000000e+00> : vector<128xf32>
    %35 = vector.multi_reduction <add>, %34, %cst_21 [0] : vector<32x128xf32> to vector<128xf32>
    %36 = vector.shape_cast %35 : vector<128xf32> to vector<1x128xf32>
    %cst_22 = arith.constant 3.200000e+01 : f32
    %37 = vector.broadcast %cst_22 : f32 to vector<1x128xf32>
    %38 = arith.divf %36, %37 : vector<1x128xf32>
    %39 = arith.mulf %33, %33 : vector<1x128xf32>
    %40 = arith.subf %38, %39 : vector<1x128xf32>
    %cst_23 = arith.constant 0.000000e+00 : f32
    %41 = vector.broadcast %cst_23 : f32 to vector<1x128xf32>
    %42 = arith.maximumf %40, %41 : vector<1x128xf32>
    %43 = vector.broadcast %33 : vector<1x128xf32> to vector<32x128xf32>
    %44 = arith.subf %29, %43 : vector<32x128xf32>
    %cst_24 = arith.constant 9.99999974E-6 : f32
    %45 = vector.broadcast %cst_24 : f32 to vector<1x128xf32>
    %46 = arith.addf %42, %45 : vector<1x128xf32>
    %47 = math.rsqrt %46 : vector<1x128xf32>
    %48 = vector.broadcast %47 : vector<1x128xf32> to vector<32x128xf32>
    %49 = arith.mulf %44, %48 : vector<32x128xf32>
    %c0_25 = arith.constant 0 : index
    %c0_26 = arith.constant 0 : index
    %50 = vector.load %arg8[%c0_25, %c0_26] : memref<32x1xf32, #tpu.memory_space<vmem>>, vector<32x1xf32>
    %51 = vector.broadcast %50 : vector<32x1xf32> to vector<32x128xf32>
    %52 = arith.mulf %49, %51 : vector<32x128xf32>
    %c0_27 = arith.constant 0 : index
    %c0_28 = arith.constant 0 : index
    %53 = vector.load %arg9[%c0_27, %c0_28] : memref<32x1xf32, #tpu.memory_space<vmem>>, vector<32x1xf32>
    %54 = vector.broadcast %53 : vector<32x1xf32> to vector<32x128xf32>
    %55 = arith.addf %52, %54 : vector<32x128xf32>
    %cst_29 = arith.constant 5.000000e-01 : f32
    %56 = vector.broadcast %cst_29 : f32 to vector<32x128xf32>
    %57 = arith.mulf %56, %55 : vector<32x128xf32>
    %cst_30 = arith.constant 0.707106769 : f32
    %58 = vector.broadcast %cst_30 : f32 to vector<32x128xf32>
    %59 = arith.mulf %55, %58 : vector<32x128xf32>
    %60 = math.erf %59 : vector<32x128xf32>
    %cst_31 = arith.constant 1.000000e+00 : f32
    %61 = vector.broadcast %cst_31 : f32 to vector<32x128xf32>
    %62 = arith.addf %61, %60 : vector<32x128xf32>
    %63 = arith.mulf %57, %62 : vector<32x128xf32>
    %c0_32 = arith.constant 0 : index
    %c0_33 = arith.constant 0 : index
    %64 = vector.load %arg10[%c0_32, %c0_33] : memref<16x32xf32, #tpu.memory_space<vmem>>, vector<16x32xf32>
    %cst_34 = arith.constant dense<0.000000e+00> : vector<16x128xf32>
    %65 = tpu.matmul %64, %63, %cst_34 {dimension_numbers = #tpu.dot_dimension_numbers<[1], [0], [0], [1], [0, 0, 1, 1], [], []>} : vector<16x32xf32>, vector<32x128xf32>, vector<16x128xf32> -> vector<16x128xf32>
    %66 = arith.addf %24, %65 : vector<16x128xf32>
    %c0_35 = arith.constant 0 : index
    %c0_36 = arith.constant 0 : index
    %67 = vector.load %arg11[%c0_35, %c0_36] : memref<16x1xf32, #tpu.memory_space<vmem>>, vector<16x1xf32>
    %68 = vector.broadcast %67 : vector<16x1xf32> to vector<16x128xf32>
    %69 = arith.addf %66, %68 : vector<16x128xf32>
    %70 = tpu.transpose %69, [1, 0] : vector<16x128xf32> -> vector<128x16xf32>
    %71 = vector.shape_cast %70 : vector<128x16xf32> to vector<4x32x16xf32>
    %72 = tpu.transpose %71, [0, 2, 1] : vector<4x32x16xf32> -> vector<4x16x32xf32>
    %c0_37 = arith.constant 0 : index
    %c0_38 = arith.constant 0 : index
    %c0_39 = arith.constant 0 : index
    %73 = vector.load %arg12[%c0_37, %c0_38, %c0_39] : memref<4x16x32xf32, #tpu.memory_space<vmem>>, vector<4x16x32xf32>
    tpu.vector_store %arg12[%c0_37, %c0_38, %c0_39], %72 {strides = array<i32>} : memref<4x16x32xf32, #tpu.memory_space<vmem>>, vector<4x16x32xf32>,
    return
  }
  func.func @transform_0(%arg0: i32) -> (i32, i32, i32) {
    %c0_i32 = arith.constant 0 : i32
    %c0_i32_0 = arith.constant 0 : i32
    %c0_i32_1 = arith.constant 0 : i32
    return %arg0, %c0_i32, %c0_i32_0 : i32, i32, i32
  }
  func.func @transform_1(%arg0: i32) -> (i32, i32) {
    %c0_i32 = arith.constant 0 : i32
    %c0_i32_0 = arith.constant 0 : i32
    %c0_i32_1 = arith.constant 0 : i32
    return %c0_i32, %c0_i32_0 : i32, i32
  }
  func.func @transform_2(%arg0: i32) -> (i32, i32) {
    %c0_i32 = arith.constant 0 : i32
    %c0_i32_0 = arith.constant 0 : i32
    %c0_i32_1 = arith.constant 0 : i32
    return %c0_i32, %c0_i32_0 : i32, i32
  }
  func.func @transform_3(%arg0: i32) -> (i32, i32) {
    %c0_i32 = arith.constant 0 : i32
    %c0_i32_0 = arith.constant 0 : i32
    %c0_i32_1 = arith.constant 0 : i32
    return %c0_i32, %c0_i32_0 : i32, i32
  }
  func.func @transform_4(%arg0: i32) -> (i32, i32) {
    %c0_i32 = arith.constant 0 : i32
    %c0_i32_0 = arith.constant 0 : i32
    %c0_i32_1 = arith.constant 0 : i32
    return %c0_i32, %c0_i32_0 : i32, i32
  }
  func.func @transform_5(%arg0: i32) -> (i32, i32) {
    %c0_i32 = arith.constant 0 : i32
    %c0_i32_0 = arith.constant 0 : i32
    %c0_i32_1 = arith.constant 0 : i32
    return %c0_i32, %c0_i32_0 : i32, i32
  }
  func.func @transform_6(%arg0: i32) -> (i32, i32) {
    %c0_i32 = arith.constant 0 : i32
    %c0_i32_0 = arith.constant 0 : i32
    %c0_i32_1 = arith.constant 0 : i32
    return %c0_i32, %c0_i32_0 : i32, i32
  }
  func.func @transform_7(%arg0: i32) -> (i32, i32) {
    %c0_i32 = arith.constant 0 : i32
    %c0_i32_0 = arith.constant 0 : i32
    %c0_i32_1 = arith.constant 0 : i32
    return %c0_i32, %c0_i32_0 : i32, i32
  }
  func.func @transform_8(%arg0: i32) -> (i32, i32) {
    %c0_i32 = arith.constant 0 : i32
    %c0_i32_0 = arith.constant 0 : i32
    %c0_i32_1 = arith.constant 0 : i32
    return %c0_i32, %c0_i32_0 : i32, i32
  }
  func.func @transform_9(%arg0: i32) -> (i32, i32) {
    %c0_i32 = arith.constant 0 : i32
    %c0_i32_0 = arith.constant 0 : i32
    %c0_i32_1 = arith.constant 0 : i32
    return %c0_i32, %c0_i32_0 : i32, i32
  }
  func.func @transform_10(%arg0: i32) -> (i32, i32) {
    %c0_i32 = arith.constant 0 : i32
    %c0_i32_0 = arith.constant 0 : i32
    %c0_i32_1 = arith.constant 0 : i32
    return %c0_i32, %c0_i32_0 : i32, i32
  }
  func.func @transform_11(%arg0: i32) -> (i32, i32, i32) {
    %c0_i32 = arith.constant 0 : i32
    %c0_i32_0 = arith.constant 0 : i32
    %c0_i32_1 = arith.constant 0 : i32
    return %arg0, %c0_i32, %c0_i32_0 : i32, i32, i32
  }
}

module attributes {stable_mosaic.version = 11 : i64} {
  func.func @mixer_kernel(%arg0: i32, %arg1: memref<4x16x32xf32, #tpu.memory_space<vmem>>, %arg2: memref<32x64xf32, #tpu.memory_space<vmem>>, %arg3: memref<1x64xf32, #tpu.memory_space<vmem>>, %arg4: memref<64x32xf32, #tpu.memory_space<vmem>>, %arg5: memref<1x32xf32, #tpu.memory_space<vmem>>, %arg6: memref<32x16xf32, #tpu.memory_space<vmem>>, %arg7: memref<32x1xf32, #tpu.memory_space<vmem>>, %arg8: memref<32x1xf32, #tpu.memory_space<vmem>>, %arg9: memref<32x1xf32, #tpu.memory_space<vmem>>, %arg10: memref<16x32xf32, #tpu.memory_space<vmem>>, %arg11: memref<16x1xf32, #tpu.memory_space<vmem>>, %arg12: memref<4x16x32xf32, #tpu.memory_space<vmem>>) attributes {dimension_semantics = [#tpu.dimension_semantics<parallel>], iteration_bounds = array<i64: 2>, scalar_prefetch = 0 : i64, scratch_operands = 0 : i64, tpu.core_type = #tpu.core_type<tc>, window_params = [{transform_indices = @transform_0, window_bounds = array<i64: 4, 16, 32>}, {pipeline_mode = #tpu.pipeline_mode<synchronous>, transform_indices = @transform_1, window_bounds = array<i64: 32, 64>}, {pipeline_mode = #tpu.pipeline_mode<synchronous>, transform_indices = @transform_2, window_bounds = array<i64: 1, 64>}, {pipeline_mode = #tpu.pipeline_mode<synchronous>, transform_indices = @transform_3, window_bounds = array<i64: 64, 32>}, {pipeline_mode = #tpu.pipeline_mode<synchronous>, transform_indices = @transform_4, window_bounds = array<i64: 1, 32>}, {pipeline_mode = #tpu.pipeline_mode<synchronous>, transform_indices = @transform_5, window_bounds = array<i64: 32, 16>}, {pipeline_mode = #tpu.pipeline_mode<synchronous>, transform_indices = @transform_6, window_bounds = array<i64: 32, 1>}, {pipeline_mode = #tpu.pipeline_mode<synchronous>, transform_indices = @transform_7, window_bounds = array<i64: 32, 1>}, {pipeline_mode = #tpu.pipeline_mode<synchronous>, transform_indices = @transform_8, window_bounds = array<i64: 32, 1>}, {pipeline_mode = #tpu.pipeline_mode<synchronous>, transform_indices = @transform_9, window_bounds = array<i64: 16, 32>}, {pipeline_mode = #tpu.pipeline_mode<synchronous>, transform_indices = @transform_10, window_bounds = array<i64: 16, 1>}, {transform_indices = @transform_11, window_bounds = array<i64: 4, 16, 32>}]} {
    %c0 = arith.constant 0 : index
    %c0_0 = arith.constant 0 : index
    %c0_1 = arith.constant 0 : index
    %0 = vector.load %arg1[%c0, %c0_0, %c0_1] : memref<4x16x32xf32, #tpu.memory_space<vmem>>, vector<4x16x32xf32>
    %1 = vector.shape_cast %0 : vector<4x16x32xf32> to vector<64x32xf32>
    %c0_2 = arith.constant 0 : index
    %c0_3 = arith.constant 0 : index
    %2 = vector.load %arg2[%c0_2, %c0_3] : memref<32x64xf32, #tpu.memory_space<vmem>>, vector<32x64xf32>
    %cst = arith.constant dense<0.000000e+00> : vector<64x64xf32>
    %3 = tpu.matmul %1, %2, %cst {dimension_numbers = #tpu.dot_dimension_numbers<[1], [0], [0], [1], [0, 0, 1, 1], [], []>} : vector<64x32xf32>, vector<32x64xf32>, vector<64x64xf32> -> vector<64x64xf32>
    %c0_4 = arith.constant 0 : index
    %c0_5 = arith.constant 0 : index
    %4 = vector.load %arg3[%c0_4, %c0_5] : memref<1x64xf32, #tpu.memory_space<vmem>>, vector<1x64xf32>
    %5 = vector.broadcast %4 : vector<1x64xf32> to vector<64x64xf32>
    %6 = arith.addf %3, %5 : vector<64x64xf32>
    %cst_6 = arith.constant 5.000000e-01 : f32
    %7 = vector.broadcast %cst_6 : f32 to vector<64x64xf32>
    %8 = arith.mulf %7, %6 : vector<64x64xf32>
    %cst_7 = arith.constant 0.707106769 : f32
    %9 = vector.broadcast %cst_7 : f32 to vector<64x64xf32>
    %10 = arith.mulf %6, %9 : vector<64x64xf32>
    %11 = math.erf %10 : vector<64x64xf32>
    %cst_8 = arith.constant 1.000000e+00 : f32
    %12 = vector.broadcast %cst_8 : f32 to vector<64x64xf32>
    %13 = arith.addf %12, %11 : vector<64x64xf32>
    %14 = arith.mulf %8, %13 : vector<64x64xf32>
    %c0_9 = arith.constant 0 : index
    %c0_10 = arith.constant 0 : index
    %15 = vector.load %arg4[%c0_9, %c0_10] : memref<64x32xf32, #tpu.memory_space<vmem>>, vector<64x32xf32>
    %cst_11 = arith.constant dense<0.000000e+00> : vector<64x32xf32>
    %16 = tpu.matmul %14, %15, %cst_11 {dimension_numbers = #tpu.dot_dimension_numbers<[1], [0], [0], [1], [0, 0, 1, 1], [], []>} : vector<64x64xf32>, vector<64x32xf32>, vector<64x32xf32> -> vector<64x32xf32>
    %c0_12 = arith.constant 0 : index
    %c0_13 = arith.constant 0 : index
    %17 = vector.load %arg5[%c0_12, %c0_13] : memref<1x32xf32, #tpu.memory_space<vmem>>, vector<1x32xf32>
    %18 = vector.broadcast %17 : vector<1x32xf32> to vector<64x32xf32>
    %19 = arith.addf %16, %18 : vector<64x32xf32>
    %20 = arith.addf %1, %19 : vector<64x32xf32>
    %21 = vector.shape_cast %20 : vector<64x32xf32> to vector<4x16x32xf32>
    %22 = tpu.transpose %21, [0, 2, 1] : vector<4x16x32xf32> -> vector<4x32x16xf32>
    %23 = vector.shape_cast %22 : vector<4x32x16xf32> to vector<128x16xf32>
    %24 = tpu.transpose %23, [1, 0] : vector<128x16xf32> -> vector<16x128xf32>
    %c0_14 = arith.constant 0 : index
    %c0_15 = arith.constant 0 : index
    %25 = vector.load %arg6[%c0_14, %c0_15] : memref<32x16xf32, #tpu.memory_space<vmem>>, vector<32x16xf32>
    %cst_16 = arith.constant dense<0.000000e+00> : vector<32x128xf32>
    %26 = tpu.matmul %25, %24, %cst_16 {dimension_numbers = #tpu.dot_dimension_numbers<[1], [0], [0], [1], [0, 0, 1, 1], [], []>} : vector<32x16xf32>, vector<16x128xf32>, vector<32x128xf32> -> vector<32x128xf32>
    %c0_17 = arith.constant 0 : index
    %c0_18 = arith.constant 0 : index
    %27 = vector.load %arg7[%c0_17, %c0_18] : memref<32x1xf32, #tpu.memory_space<vmem>>, vector<32x1xf32>
    %28 = vector.broadcast %27 : vector<32x1xf32> to vector<32x128xf32>
    %29 = arith.addf %26, %28 : vector<32x128xf32>
    %cst_19 = arith.constant dense<0.000000e+00> : vector<128xf32>
    %30 = vector.multi_reduction <add>, %29, %cst_19 [0] : vector<32x128xf32> to vector<128xf32>
    %31 = vector.shape_cast %30 : vector<128xf32> to vector<1x128xf32>
    %cst_20 = arith.constant 3.200000e+01 : f32
    %32 = vector.broadcast %cst_20 : f32 to vector<1x128xf32>
    %33 = arith.divf %31, %32 : vector<1x128xf32>
    %34 = arith.mulf %29, %29 : vector<32x128xf32>
    %cst_21 = arith.constant dense<0.000000e+00> : vector<128xf32>
    %35 = vector.multi_reduction <add>, %34, %cst_21 [0] : vector<32x128xf32> to vector<128xf32>
    %36 = vector.shape_cast %35 : vector<128xf32> to vector<1x128xf32>
    %cst_22 = arith.constant 3.200000e+01 : f32
    %37 = vector.broadcast %cst_22 : f32 to vector<1x128xf32>
    %38 = arith.divf %36, %37 : vector<1x128xf32>
    %39 = arith.mulf %33, %33 : vector<1x128xf32>
    %40 = arith.subf %38, %39 : vector<1x128xf32>
    %cst_23 = arith.constant 0.000000e+00 : f32
    %41 = vector.broadcast %cst_23 : f32 to vector<1x128xf32>
    %42 = arith.maximumf %40, %41 : vector<1x128xf32>
    %43 = vector.broadcast %33 : vector<1x128xf32> to vector<32x128xf32>
    %44 = arith.subf %29, %43 : vector<32x128xf32>
    %cst_24 = arith.constant 9.99999974E-6 : f32
    %45 = vector.broadcast %cst_24 : f32 to vector<1x128xf32>
    %46 = arith.addf %42, %45 : vector<1x128xf32>
    %47 = math.rsqrt %46 : vector<1x128xf32>
    %48 = vector.broadcast %47 : vector<1x128xf32> to vector<32x128xf32>
    %49 = arith.mulf %44, %48 : vector<32x128xf32>
    %c0_25 = arith.constant 0 : index
    %c0_26 = arith.constant 0 : index
    %50 = vector.load %arg8[%c0_25, %c0_26] : memref<32x1xf32, #tpu.memory_space<vmem>>, vector<32x1xf32>
    %51 = vector.broadcast %50 : vector<32x1xf32> to vector<32x128xf32>
    %52 = arith.mulf %49, %51 : vector<32x128xf32>
    %c0_27 = arith.constant 0 : index
    %c0_28 = arith.constant 0 : index
    %53 = vector.load %arg9[%c0_27, %c0_28] : memref<32x1xf32, #tpu.memory_space<vmem>>, vector<32x1xf32>
    %54 = vector.broadcast %53 : vector<32x1xf32> to vector<32x128xf32>
    %55 = arith.addf %52, %54 : vector<32x128xf32>
    %cst_29 = arith.constant 5.000000e-01 : f32
    %56 = vector.broadcast %cst_29 : f32 to vector<32x128xf32>
    %57 = arith.mulf %56, %55 : vector<32x128xf32>
    %cst_30 = arith.constant 0.707106769 : f32
    %58 = vector.broadcast %cst_30 : f32 to vector<32x128xf32>
    %59 = arith.mulf %55, %58 : vector<32x128xf32>
    %60 = math.erf %59 : vector<32x128xf32>
    %cst_31 = arith.constant 1.000000e+00 : f32
    %61 = vector.broadcast %cst_31 : f32 to vector<32x128xf32>
    %62 = arith.addf %61, %60 : vector<32x128xf32>
    %63 = arith.mulf %57, %62 : vector<32x128xf32>
    %c0_32 = arith.constant 0 : index
    %c0_33 = arith.constant 0 : index
    %64 = vector.load %arg10[%c0_32, %c0_33] : memref<16x32xf32, #tpu.memory_space<vmem>>, vector<16x32xf32>
    %cst_34 = arith.constant dense<0.000000e+00> : vector<16x128xf32>
    %65 = tpu.matmul %64, %63, %cst_34 {dimension_numbers = #tpu.dot_dimension_numbers<[1], [0], [0], [1], [0, 0, 1, 1], [], []>} : vector<16x32xf32>, vector<32x128xf32>, vector<16x128xf32> -> vector<16x128xf32>
    %66 = arith.addf %24, %65 : vector<16x128xf32>
    %c0_35 = arith.constant 0 : index
    %c0_36 = arith.constant 0 : index
    %67 = vector.load %arg11[%c0_35, %c0_36] : memref<16x1xf32, #tpu.memory_space<vmem>>, vector<16x1xf32>
    %68 = vector.broadcast %67 : vector<16x1xf32> to vector<16x128xf32>
    %69 = arith.addf %66, %68 : vector<16x128xf32>
    %70 = tpu.transpose %69, [1, 0] : vector<16x128xf32> -> vector<128x16xf32>
    %71 = vector.shape_cast %70 : vector<128x16xf32> to vector<4x32x16xf32>
    %72 = tpu.transpose %71, [0, 2, 1] : vector<4x32x16xf32> -> vector<4x16x32xf32>
    %c0_37 = arith.constant 0 : index
    %c0_38 = arith.constant 0 : index
    %c0_39 = arith.constant 0 : index
    %73 = vector.load %arg12[%c0_37, %c0_38, %c0_39] : memref<4x16x32xf32, #tpu.memory_space<vmem>>, vector<4x16x32xf32>
    tpu.vector_store %arg12[%c0_37, %c0_38, %c0_39], %72 {strides = array<i32>} : memref<4x16x32xf32, #tpu.memory_space<vmem>>, vector<4x16x32xf32>,
    return
  }
  func.func @transform_0(%arg0: i32) -> (i32, i32, i32) {
    %c0_i32 = arith.constant 0 : i32
    %c0_i32_0 = arith.constant 0 : i32
    %c0_i32_1 = arith.constant 0 : i32
    return %arg0, %c0_i32, %c0_i32_0 : i32, i32, i32
  }
  func.func @transform_1(%arg0: i32) -> (i32, i32) {
    %c0_i32 = arith.constant 0 : i32
    %c0_i32_0 = arith.constant 0 : i32
    %c0_i32_1 = arith.constant 0 : i32
    return %c0_i32, %c0_i32_0 : i32, i32
  }
  func.func @transform_2(%arg0: i32) -> (i32, i32) {
    %c0_i32 = arith.constant 0 : i32
    %c0_i32_0 = arith.constant 0 : i32
    %c0_i32_1 = arith.constant 0 : i32
    return %c0_i32, %c0_i32_0 : i32, i32
  }
  func.func @transform_3(%arg0: i32) -> (i32, i32) {
    %c0_i32 = arith.constant 0 : i32
    %c0_i32_0 = arith.constant 0 : i32
    %c0_i32_1 = arith.constant 0 : i32
    return %c0_i32, %c0_i32_0 : i32, i32
  }
  func.func @transform_4(%arg0: i32) -> (i32, i32) {
    %c0_i32 = arith.constant 0 : i32
    %c0_i32_0 = arith.constant 0 : i32
    %c0_i32_1 = arith.constant 0 : i32
    return %c0_i32, %c0_i32_0 : i32, i32
  }
  func.func @transform_5(%arg0: i32) -> (i32, i32) {
    %c0_i32 = arith.constant 0 : i32
    %c0_i32_0 = arith.constant 0 : i32
    %c0_i32_1 = arith.constant 0 : i32
    return %c0_i32, %c0_i32_0 : i32, i32
  }
  func.func @transform_6(%arg0: i32) -> (i32, i32) {
    %c0_i32 = arith.constant 0 : i32
    %c0_i32_0 = arith.constant 0 : i32
    %c0_i32_1 = arith.constant 0 : i32
    return %c0_i32, %c0_i32_0 : i32, i32
  }
  func.func @transform_7(%arg0: i32) -> (i32, i32) {
    %c0_i32 = arith.constant 0 : i32
    %c0_i32_0 = arith.constant 0 : i32
    %c0_i32_1 = arith.constant 0 : i32
    return %c0_i32, %c0_i32_0 : i32, i32
  }
  func.func @transform_8(%arg0: i32) -> (i32, i32) {
    %c0_i32 = arith.constant 0 : i32
    %c0_i32_0 = arith.constant 0 : i32
    %c0_i32_1 = arith.constant 0 : i32
    return %c0_i32, %c0_i32_0 : i32, i32
  }
  func.func @transform_9(%arg0: i32) -> (i32, i32) {
    %c0_i32 = arith.constant 0 : i32
    %c0_i32_0 = arith.constant 0 : i32
    %c0_i32_1 = arith.constant 0 : i32
    return %c0_i32, %c0_i32_0 : i32, i32
  }
  func.func @transform_10(%arg0: i32) -> (i32, i32) {
    %c0_i32 = arith.constant 0 : i32
    %c0_i32_0 = arith.constant 0 : i32
    %c0_i32_1 = arith.constant 0 : i32
    return %c0_i32, %c0_i32_0 : i32, i32
  }
  func.func @transform_11(%arg0: i32) -> (i32, i32, i32) {
    %c0_i32 = arith.constant 0 : i32
    %c0_i32_0 = arith.constant 0 : i32
    %c0_i32_1 = arith.constant 0 : i32
    return %arg0, %c0_i32, %c0_i32_0 : i32, i32, i32
  }
}

</mosaic_0001>

<bundles_post_ra>
// kernel: tpu_custom_call.1
= control target key start
LH: loop header
LB: loop body
LE: loop exit
PB: predicated region body
PF: predicated region fallthrough
CT: control target
= control target key end

     0   :  { %16 = vsyncpa [#allocation3], 0  ;;  %s2136_s0 = inlined_call_operand.vmem [shape: f32[8,16,32], index: 0, kind: input, shape index: {}]   ;;  %s2137_s1 = inlined_call_operand.vmem [shape: f32[32,64], index: 1, kind: input, shape index: {}]   ;;  %s2138_s2 = inlined_call_operand.vmem [shape: f32[1,64], index: 2, kind: input, shape index: {}]   ;;  %s2139_s3 = inlined_call_operand.vmem [shape: f32[64,32], index: 3, kind: input, shape index: {}]   ;;  %s2140_s4 = inlined_call_operand.vmem [shape: f32[1,32], index: 4, kind: input, shape index: {}]   ;;  %s2141_s5 = inlined_call_operand.vmem [shape: f32[32,16], index: 5, kind: input, shape index: {}]   ;;  %s2142_s6 = inlined_call_operand.vmem [shape: f32[32,1], index: 6, kind: input, shape index: {}]   ;;  %s2143_s7 = inlined_call_operand.vmem [shape: f32[32,1], index: 7, kind: input, shape index: {}]   ;;  %s2144_s8 = inlined_call_operand.vmem [shape: f32[32,1], index: 8, kind: input, shape index: {}]   ;;  %s2145_s9 = inlined_call_operand.vmem [shape: f32[16,32], index: 9, kind: input, shape index: {}]   ;;  %s2146_s10 = inlined_call_operand.vmem [shape: f32[16,1], index: 10, kind: input, shape index: {}]   ;;  %s2147_s11 = inlined_call_operand.hbm [shape: f32[8,16,32], index: 11, kind: output, shape index: {}]  }
   0x1   :  { %18 = vsyncpa [#allocation3 + $0x1], 0  ;;  %s1862_s17 = smov 0   ;;  %s1864_s18 = smov 0  }
   0x2   :  { %s1866_s19 = smov 0   ;;  %s1868_s20 = smov 0  }
   0x3 LB: > { %s1883_s21 = sadd.s32 4294967295, %s1796_s20   ;;  %s1477_s22 = sadd.s32 4294967294, %s1796_s20   ;;  %s1796_s20 = sphi %s1868_s20, %s2153_s20   ;;  %s1792_s19 = sphi %s1866_s19, %s2152_s19   ;;  %s1788_s18 = sphi %s1864_s18, %s2151_s18   ;;  %s1784_s17 = sphi %s1862_s17, %s2150_s17  }
   0x4   : > { %s1887_s23 = sadd.s32 1, %s1796_s20   ;;  %s267_s24 = sadd.s32 1, %s1792_s19 }
   0x5   : > { %s264_s25 = ssub.s32 %s1796_s20, %s1887_s23  ;;  %p277_p0 = scmp.ne.s32.totalorder %s1792_s19, %s1788_s18 }
   0x6   : > { %p265_p1 = scmp.eq.s32.totalorder %s264_s25, 0  ;;  %p278_p2 = scmp.eq.s32.totalorder %s1883_s21, 1 }
   0x7   : > { %p283_p3 = scmp.ne.s32.totalorder %s1788_s18, %s1784_s17  ;;  %p284_p4 = scmp.eq.s32.totalorder %s1477_s22, 1 }
   0x8   : > { %s1898_s26 = scalar_select %p265_p1, %s1792_s19, %s267_s24  }
   0x9   : > { %p1900_p5 = por %p278_p2, %p277_p0  ;;  %p1904_p6 = por %p284_p4, %p283_p3 }
   0xa   : > { %p1480_p7 = scmp.ge.s32.totalorder %s1796_s20, 1  ;;  %p342_p8 = scmp.lt.s32.totalorder %s1796_s20, 3 }
   0xc   : > { %p343_p9 = pnand %p1480_p7, %p342_p8 }
   0xd   : > { %v399_v0 = vld [vmem:[%s2137_s1] sm:$0xff] (!%p343_p9)  ;;  %v400_v1 = vld [vmem:[%s2137_s1 + $0x8] sm:$0xff] (!%p343_p9)  ;;  %v401_v2 = vld [vmem:[%s2137_s1 + $0x10] sm:$0xff] (!%p343_p9)  ;;  %s1482_s16 = sshll.u32 (!%p343_p9), %s1883_s21, 2  ;;  %vm410_vm0 = vcmask (!%p343_p9), 261120   ;;  %vm595_vm1 = vcmask (!%p343_p9), 523264  }
   0xe   : > { %346 = sbr.rel (%p343_p9) target bundleno = 1577 (0x629), region = 64  ;;  %v1627_v3 = vpack.c.bf16 (!%p343_p9), %v400_v1, %v399_v0  ;;  %v402_v4 = vld [vmem:[%s2137_s1 + $0x18] sm:$0xff] (!%p343_p9)  ;;  %p384_p10 = scmp.lt.s32.totalorder (!%p343_p9), %s1482_s16, 7  ;;  %v580_v14 = vld [vmem:[%s2139_s3] sm:$0xff] (!%p343_p9)  ;;  %v581_v15 = vld [vmem:[%s2139_s3 + $0x8] sm:$0xff] (!%p343_p9)  ;;  %vm921_vm2 = vcmask (!%p343_p9), 130048  }
   0xf   : > { %v1631_v5 = vpack.c.bf16 (!%p343_p9), %v402_v4, %v401_v2  ;;  %v1635_v16 = vpack.c.bf16 (!%p343_p9), %v581_v15, %v580_v14  ;;  %v582_v17 = vld [vmem:[%s2139_s3 + $0x10] sm:$0xff] (!%p343_p9)  ;;  %v583_v18 = vld [vmem:[%s2139_s3 + $0x18] sm:$0xff] (!%p343_p9)  ;;  %v584_v20 = vld [vmem:[%s2139_s3 + $0x20] sm:$0xff] (!%p343_p9)  ;;  %s380_s13 = sand.u32 (!%p343_p9), 1, %s1788_s18  }
  0x10   : > { %1628 = vmatprep.subr.bf16.mxu0 (!%p343_p9), %v1627_v3  ;;  %v1639_v19 = vpack.c.bf16 (!%p343_p9), %v583_v18, %v582_v17  ;;  %v585_v21 = vld [vmem:[%s2139_s3 + $0x28] sm:$0xff] (!%p343_p9)  ;;  %v586_v23 = vld [vmem:[%s2139_s3 + $0x30] sm:$0xff] (!%p343_p9)  ;;  %v587_v24 = vld [vmem:[%s2139_s3 + $0x38] sm:$0xff] (!%p343_p9)  ;;  %s1481_s14 = sshll.u32 (!%p343_p9), %s380_s13, 6  ;;  %s2095_s30 = scalar_lea.sflag (!%p343_p9), [#allocation3], %s380_s13 }
  0x11   : > { %1630 = vmatpush3.bf16.msra.mxu0 (!%p343_p9), %v1627_v3  ;;  %1636 = vmatprep.subr.bf16.mxu1 (!%p343_p9), %v1635_v16  ;;  %v1643_v22 = vpack.c.bf16 (!%p343_p9), %v585_v21, %v584_v20  ;;  %v1647_v25 = vpack.c.bf16 (!%p343_p9), %v587_v24, %v586_v23  ;;  %v1485_v26 = vld [vmem:[%s2138_s2] ss:$0 sm:$0xff] (!%p343_p9)  ;;  %s382_s15 = scalar_lea.vmem (!%p343_p9), [#allocation2], %s1481_s14 }
  0x12   : > { %1632 = vmatprep.subr.bf16.mxu0 (!%p343_p9), %v1631_v5  ;;  %1638 = vmatpush3.bf16.msra.mxu1 (!%p343_p9), %v1635_v16  ;;  %s1415_s22 = sshll.u32 (!%p343_p9), %s382_s15, 4  ;;  %s2092_s22 = int_to_ptr.vmem [resolvable:$true] %s1415_s22 }
  0x13   : > { %1640 = vmatprep.subr.bf16.mxu1 (!%p343_p9), %v1639_v19 }
  0x15   : > { %s2155_s16 = smov (!%p384_p10, %s1482_s16), 7  ;;  %1634 = vmatpush3.bf16.msra.mxu0 %v1631_v5 }
  0x16   : > { %s1515_s25 = sshll.u32 %s2155_s16, 4  ;;  %1642 = vmatpush3.bf16.msra.mxu1 %v1639_v19  ;;  %s1517_s16 = sshll.u32 %s1883_s21, 10 }
  0x17   : > { %s388_s12 = scalar_lea.vmem %s2136_s0, %s1515_s25  ;;  %1644 = vmatprep.subr.bf16.mxu1 %v1643_v22  ;;  %s2090_s29 = scalar_lea.hbm %s2147_s11, %s1517_s16 }
  0x18   : > { %v1926_v6 = vld [vmem:[%s388_s12] sm:$0xff]  ;;  %v1930_v7 = vld [vmem:[%s388_s12 + $0x8] sm:$0xff]  ;;  %v1932_v8 = vld [vmem:[%s388_s12 + $0x10] sm:$0xff]  ;;  %s1734_s21 = scalar_lea.vmem %s2092_s22, 1024 }
  0x19   : > { %1566 = vmatprep.mubr.msk.f32.mxu0 %vm410_vm0, %v1926_v6  ;;  %v1938_v9 = vld [vmem:[%s388_s12 + $0x18] sm:$0xff]  ;;  %v1940_v10 = vld [vmem:[%s388_s12 + $0x20] sm:$0xff]  ;;  %v1946_v11 = vld [vmem:[%s388_s12 + $0x28] sm:$0xff]  ;;  %p1735_p11 = scmp.ne.s32.totalorder %s2092_s22, %s1734_s21 }
  0x1a   : > { %1567 = vmatmul.mubr.msk.f32.vlgmr.msra.gmra.mrb[0].mxu0 %vm410_vm0, %v1930_v7  ;;  %v1948_v12 = vld [vmem:[%s388_s12 + $0x30] sm:$0xff]  ;;  %v1954_v13 = vld [vmem:[%s388_s12 + $0x38] sm:$0xff]  ;;  %1646 = vmatpush3.bf16.msra.mxu1 %v1643_v22  ;;  %s1799_s12 = smov [#allocation2]  }
  0x1b   : > { %1569 = vmatprep.mubr.msk.f32.mxu0 %vm410_vm0, %v1932_v8  ;;  %1648 = vmatprep.subr.bf16.mxu1 %v1647_v25  ;;  %p1736_p12 = pnand %p1735_p11, %p1900_p5  ;;  %s1738_s14 = sshll.u32 %s1799_s12, 4  ;;  %s1739_s14 = int_to_ptr.vmem [resolvable:$false] %s1738_s14 }
  0x1c   : > { %s1740_s16 = scalar_lea.vmem %s1739_s14, 2048  ;;  %p1741_p0 = scmp.lt.s32.totalorder %s2092_s22, %s1739_s14 }
  0x1d   : > { %p1737_p13 = pneg %p1736_p12  ;;  %p1742_p1 = scmp.lt.s32.totalorder %s1740_s16, %s1734_s21 }
  0x1e   : > { %1570 = vmatmul.mubr.msk.f32.gmra.mrb[2].mxu0 %vm410_vm0, %v1938_v9  ;;  %1650 = vmatpush3.bf16.msra.mxu1 %v1647_v25 }
  0x1f   : > { %1572 = vmatprep.mubr.msk.f32.mxu0 %vm410_vm0, %v1940_v10  ;;  %p1743_p2 = por %p1742_p1, %p1741_p0 }
  0x21   : > { %p1744_p3 = pnand %p1743_p2, %p1737_p13 }
  0x22   : > { %1573 = vmatmul.mubr.msk.f32.gmra.mrb[4].mxu0 %vm410_vm0, %v1946_v11 }
  0x23   : > { %1575 = vmatprep.mubr.msk.f32.mxu0 %vm410_vm0, %v1948_v12 }
  0x26   : > { %1576 = vmatmul.mubr.msk.f32.gmra.mrb[6].mxu0 %vm410_vm0, %v1954_v13 }
  0xed   : > { %v1568_v27 = vpop.f32.mrb[0].mxu0 }
  0xee   : > { %v507_v28 = vadd.f32 %v1568_v27, %v1485_v26  ;;  %v501_v29 = vpop.f32.mrb[1].mxu0  ;;  %v1494_v27 = vld [vmem:[%s2140_s4] ss:$0 sm:$0xff] }
  0xef   : > { %v502_v30 = vadd.f32 %v1485_v26, %v501_v29 }
  0xf0   : > { %v549_v31 = vmul.f32 0.70710677, %v507_v28  ;;  %v541_v56 = vmul.f32 0.5, %v507_v28 }
  0xf1   : > { %v548_v32 = vmul.f32 0.70710677, %v502_v30  ;;  %v1571_v33 = vpop.f32.mrb[2].mxu0  ;;  %v540_v54 = vmul.f32 0.5, %v502_v30 }
  0xf2   : > { %1708 = verf.f32 %v549_v31  ;;  %v517_v34 = vadd.f32 %v1571_v33, %v1485_v26  ;;  %v511_v35 = vpop.f32.mrb[3].mxu0 }
  0xf3   : > { %1710 = verf.f32 %v548_v32  ;;  %v512_v36 = vadd.f32 %v1485_v26, %v511_v35 }
  0xf4   : > { %v551_v37 = vmul.f32 0.70710677, %v517_v34  ;;  %v543_v61 = vmul.f32 0.5, %v517_v34 }
  0xf5   : > { %v550_v38 = vmul.f32 0.70710677, %v512_v36  ;;  %v1574_v39 = vpop.f32.mrb[4].mxu0  ;;  %v542_v63 = vmul.f32 0.5, %v512_v36 }
  0xf6   : > { %1712 = verf.f32 %v551_v37  ;;  %v527_v40 = vadd.f32 %v1574_v39, %v1485_v26  ;;  %v521_v41 = vpop.f32.mrb[5].mxu0 }
  0xf7   : > { %1714 = verf.f32 %v550_v38  ;;  %v522_v42 = vadd.f32 %v1485_v26, %v521_v41 }
  0xf8   : > { %v553_v43 = vmul.f32 0.70710677, %v527_v40  ;;  %v545_v1 = vmul.f32 0.5, %v527_v40 }
  0xf9   : > { %v552_v44 = vmul.f32 0.70710677, %v522_v42  ;;  %v1577_v45 = vpop.f32.mrb[6].mxu0  ;;  %v544_v4 = vmul.f32 0.5, %v522_v42 }
  0xfa   : > { %1716 = verf.f32 %v553_v43  ;;  %v537_v46 = vadd.f32 %v1577_v45, %v1485_v26  ;;  %v531_v47 = vpop.f32.mrb[7].mxu0 }
  0xfb   : > { %1718 = verf.f32 %v552_v44  ;;  %v532_v48 = vadd.f32 %v1485_v26, %v531_v47 }
  0xfc   : > { %v1709_v49 = vpop.eup %1708  ;;  %v555_v50 = vmul.f32 0.70710677, %v537_v46  ;;  %v547_v18 = vmul.f32 0.5, %v537_v46 }
  0xfd   : > { %v1711_v51 = vpop.eup %1710  ;;  %v565_v52 = vadd.f32 1.0, %v1709_v49  ;;  %v554_v53 = vmul.f32 0.70710677, %v532_v48  ;;  %v546_v21 = vmul.f32 0.5, %v532_v48 }
  0xfe   : > { %v564_v55 = vadd.f32 1.0, %v1711_v51  ;;  %1720 = verf.f32 %v555_v50 }
  0xff   : > { %1722 = verf.f32 %v554_v53  ;;  %v573_v60 = vmul.f32 %v565_v52, %v541_v56  ;;  %v1798_v52 = vmov 0   ;;  %v898_v53 = vld [vmem:[%s2142_s6 + $0x8] sm:$0xff] }
 0x100   : > { %v1713_v57 = vpop.eup %1712  ;;  %v572_v58 = vmul.f32 %v564_v55, %v540_v54  ;;  %v899_v55 = vld [vmem:[%s2142_s6 + $0x10] sm:$0xff] }
 0x101   : > { %v1715_v59 = vpop.eup %1714  ;;  %v567_v62 = vadd.f32 1.0, %v1713_v57 }
 0x102   : > { %v566_v0 = vadd.f32 1.0, %v1715_v59  ;;  %1594 = vmatprep.mubr.msk.f32.mxu1 %vm595_vm1, %v572_v58  ;;  %v900_v58 = vld [vmem:[%s2142_s6 + $0x18] sm:$0xff] }
 0x103   : > { %1595 = vmatmul.mubr.msk.f32.vlgmr.msra.gmra.mrb[0].mxu1 %vm595_vm1, %v573_v60  ;;  %v575_v14 = vmul.f32 %v567_v62, %v543_v61  ;;  %v1057_v60 = vld [vmem:[%s2143_s7] sm:$0xff]  ;;  %v1058_v61 = vld [vmem:[%s2143_s7 + $0x8] sm:$0xff] }
 0x104   : > { %v1717_v2 = vpop.eup %1716  ;;  %v574_v3 = vmul.f32 %v566_v0, %v542_v63  ;;  %v1085_v63 = vld [vmem:[%s2144_s8] sm:$0xff] }
 0x105   : > { %v1719_v5 = vpop.eup %1718  ;;  %v569_v15 = vadd.f32 1.0, %v1717_v2  ;;  %v1086_v2 = vld [vmem:[%s2144_s8 + $0x8] sm:$0xff] }
 0x106   : > { %v568_v16 = vadd.f32 1.0, %v1719_v5  ;;  %1597 = vmatprep.mubr.msk.f32.mxu1 %vm595_vm1, %v574_v3  ;;  %v1087_v5 = vld [vmem:[%s2144_s8 + $0x10] sm:$0xff] }
 0x107   : > { %v577_v17 = vmul.f32 %v569_v15, %v545_v1  ;;  %1598 = vmatmul.mubr.msk.f32.gmra.mrb[2].mxu1 %vm595_vm1, %v575_v14  ;;  %v1088_v15 = vld [vmem:[%s2144_s8 + $0x18] sm:$0xff] }
 0x108   : > { %v1721_v19 = vpop.eup %1720  ;;  %v576_v20 = vmul.f32 %v568_v16, %v544_v4  ;;  %v1059_v4 = vld [vmem:[%s2143_s7 + $0x10] sm:$0xff] }
 0x109   : > { %v1723_v22 = vpop.eup %1722  ;;  %v571_v23 = vadd.f32 1.0, %v1721_v19  ;;  %v1060_v19 = vld [vmem:[%s2143_s7 + $0x18] sm:$0xff] }
 0x10a   : > { %v570_v24 = vadd.f32 1.0, %v1723_v22  ;;  %1600 = vmatprep.mubr.msk.f32.mxu1 %vm595_vm1, %v576_v20 }
 0x10b   : > { %v579_v25 = vmul.f32 %v571_v23, %v547_v18  ;;  %1601 = vmatmul.mubr.msk.f32.gmra.mrb[4].mxu1 %vm595_vm1, %v577_v17  ;;  %v1218_v17 = vld [vmem:[%s2146_s10] sm:$0xff]  ;;  %v1219_v18 = vld [vmem:[%s2146_s10 + $0x8] sm:$0xff] }
 0x10c   : > { %v578_v26 = vmul.f32 %v570_v24, %v546_v21  ;;  %v894_v23 = vld [vmem:[%s2141_s5 + $0x8] sm:$0xff]  ;;  %v895_v24 = vld [vmem:[%s2141_s5 + $0x10] sm:$0xff] }
 0x10e   : > { %1603 = vmatprep.mubr.msk.f32.mxu1 %vm595_vm1, %v578_v26  ;;  %v1133_v26 = vld [vmem:[%s2145_s9] sm:$0xff] }
 0x10f   : > { %1604 = vmatmul.mubr.msk.f32.gmra.mrb[6].mxu1 %vm595_vm1, %v579_v25  ;;  %v896_v25 = vld [vmem:[%s2141_s5 + $0x18] sm:$0xff] }
 0x1d6   : > { %v1596_v28 = vpop.f32.mrb[0].mxu1 }
 0x1d7   : > { %v686_v29 = vpop.f32.mrb[1].mxu1  ;;  %v692_v31 = vadd.f32 %v1596_v28, %v1494_v27 }
 0x1d8   : > { %v687_v30 = vadd.f32 %v1494_v27, %v686_v29 }
 0x1d9   : > { %v726_v38 = vadd.f32 %v692_v31, %v1930_v7 }
 0x1da   : > { %v1599_v32 = vpop.f32.mrb[2].mxu1  ;;  %v725_v33 = vadd.f32 %v687_v30, %v1926_v6 }
 0x1db   : > { %v696_v34 = vpop.f32.mrb[3].mxu1  ;;  %v702_v36 = vadd.f32 %v1599_v32, %v1494_v27 }
 0x1dc   : > { %v697_v35 = vadd.f32 %v1494_v27, %v696_v34  ;;  %733 = vxpose.xlu0.b32.start [1/2] (short) (narrow) %v725_v33, 32 }
 0x1dd   : > { %v728_v42 = vadd.f32 %v702_v36, %v1938_v9 }
 0x1de   : > { %v727_v37 = vadd.f32 %v697_v35, %v1932_v8  ;;  %v1602_v39 = vpop.f32.mrb[4].mxu1 }
 0x1df   : > { %v706_v40 = vpop.f32.mrb[5].mxu1  ;;  %v712_v45 = vadd.f32 %v1602_v39, %v1494_v27 }
 0x1e0   : > { %765 = vxpose.xlu1.b32.start [1/2] (short) (narrow) %v727_v37, 32  ;;  %734 = vxpose.xlu0.b32.end [2/2] (short) (narrow) %v726_v38, 32  ;;  %v707_v41 = vadd.f32 %v1494_v27, %v706_v40 }
 0x1e1   : > { %v730_v47 = vadd.f32 %v712_v45, %v1946_v11 }
 0x1e2   : > { %v1605_v43 = vpop.f32.mrb[6].mxu1  ;;  %v729_v6 = vadd.f32 %v707_v41, %v1940_v10  ;;  %v893_v10 = vld [vmem:[%s2141_s5] sm:$0xff] }
 0x1e3   : > { %v716_v44 = vpop.f32.mrb[7].mxu1  ;;  %v722_v8 = vadd.f32 %v1605_v43, %v1494_v27  ;;  %1610 = vmatprep.mubr.msk.f32.mxu0 %vm921_vm2, %v893_v10 }
 0x1e4   : > { %766 = vxpose.xlu1.b32.end [2/2] (short) (narrow) %v728_v42, 32  ;;  %v717_v46 = vadd.f32 %v1494_v27, %v716_v44 }
 0x1e5   : > { %v732_v48 = vadd.f32 %v722_v8, %v1954_v13  ;;  %v897_v13 = vld [vmem:[%s2142_s6] sm:$0xff] }
 0x1e6   : > { %v731_v7 = vadd.f32 %v717_v46, %v1948_v12 }
 0x1e9   : > { %797 = vxpose.xlu0.b32.start [1/2] (short) (narrow) %v729_v6, 32 }
 0x1ed   : > { %798 = vxpose.xlu0.b32.end [2/2] (short) (narrow) %v730_v47, 32  ;;  %829 = vxpose.xlu1.b32.start [1/2] (short) (narrow) %v731_v7, 32 }
 0x1f1   : > { %830 = vxpose.xlu1.b32.end [2/2] (short) (narrow) %v732_v48, 32 }
 0x20f   : > { %1706 = vset.pattern.permute.xlu1 %v1798_v52 }
 0x217   : > { %903 = vperm.xlu1 %1706, %v897_v13  }
 0x21b   : > { %908 = vperm.xlu1 %1706, %v898_v53  }
 0x21f   : > { %913 = vperm.xlu1 %1706, %v899_v55  }
 0x223   : > { %918 = vperm.xlu1 %1706, %v900_v58  }
 0x227   : > { %1063 = vperm.xlu1 %1706, %v1057_v60  }
 0x22b   : > { %1068 = vperm.xlu1 %1706, %v1058_v61  }
 0x22f   : > { %1091 = vperm.xlu1 %1706, %v1085_v63  }
 0x233   : > { %1096 = vperm.xlu1 %1706, %v1086_v2  }
 0x237   : > { %1073 = vperm.xlu1 %1706, %v1059_v4  }
 0x23b   : > { %1101 = vperm.xlu1 %1706, %v1087_v5  }
 0x23f   : > { %1106 = vperm.xlu1 %1706, %v1088_v15  }
 0x243   : > { %1222 = vperm.xlu1 %1706, %v1218_v17  }
 0x247   : > { %1227 = vperm.xlu1 %1706, %v1219_v18  }
 0x25c   : > { %v749_v49 = vpop.trf.xlu0 }
 0x25d   : > { %861 = vxpose.xlu0.b32.start [1/16] (narrow) %v749_v49, 16 }
 0x260   : > { %v750_v9 = vpop.trf.xlu0  ;;  %v781_v51 = vpop.trf.xlu1 }
 0x261   : > { %862 = vxpose.xlu0.b32.cont [2/16] (narrow) %v750_v9, 16 }
 0x264   : > { %v751_v50 = vpop.trf.xlu0  ;;  %v782_v12 = vpop.trf.xlu1 }
 0x265   : > { %863 = vxpose.xlu0.b32.cont [3/16] (narrow) %v751_v50, 16 }
 0x268   : > { %v752_v11 = vpop.trf.xlu0  ;;  %v783_v54 = vpop.trf.xlu1 }
 0x269   : > { %864 = vxpose.xlu0.b32.cont [4/16] (narrow) %v752_v11, 16 }
 0x26c   : > { %v813_v56 = vpop.trf.xlu0  ;;  %v784_v57 = vpop.trf.xlu1 }
 0x26d   : > { %865 = vxpose.xlu0.b32.cont [5/16] (narrow) %v781_v51, 16 }
 0x270   : > { %v814_v59 = vpop.trf.xlu0  ;;  %v845_v0 = vpop.trf.xlu1 }
 0x271   : > { %866 = vxpose.xlu0.b32.cont [6/16] (narrow) %v782_v12, 16 }
 0x274   : > { %v815_v62 = vpop.trf.xlu0  ;;  %v846_v3 = vpop.trf.xlu1 }
 0x275   : > { %867 = vxpose.xlu0.b32.cont [7/16] (narrow) %v783_v54, 16 }
 0x278   : > { %v816_v1 = vpop.trf.xlu0  ;;  %v847_v14 = vpop.trf.xlu1 }
 0x279   : > { %868 = vxpose.xlu0.b32.cont [8/16] (narrow) %v784_v57, 16 }
 0x27c   : > { %v848_v16 = vpop.trf.xlu1 }
 0x27d   : > { %869 = vxpose.xlu0.b32.cont [9/16] (narrow) %v813_v56, 16 }
 0x281   : > { %870 = vxpose.xlu0.b32.cont [10/16] (narrow) %v814_v59, 16 }
 0x285   : > { %871 = vxpose.xlu0.b32.cont [11/16] (narrow) %v815_v62, 16 }
 0x289   : > { %872 = vxpose.xlu0.b32.cont [12/16] (narrow) %v816_v1, 16 }
 0x28d   : > { %873 = vxpose.xlu0.b32.cont [13/16] (narrow) %v845_v0, 16 }
 0x291   : > { %874 = vxpose.xlu0.b32.cont [14/16] (narrow) %v846_v3, 16 }
 0x295   : > { %875 = vxpose.xlu0.b32.cont [15/16] (narrow) %v847_v14, 16 }
 0x296   : > { %v904_v27 = vpop.permute.xlu1 %903 }
 0x299   : > { %876 = vxpose.xlu0.b32.end [16/16] (narrow) %v848_v16, 16 }
 0x29a   : > { %v909_v28 = vpop.permute.xlu1 %908 }
 0x29e   : > { %v914_v29 = vpop.permute.xlu1 %913 }
 0x2a2   : > { %v919_v38 = vpop.permute.xlu1 %918 }
 0x2a6   : > { %v1064_v47 = vpop.permute.xlu1 %1063 }
 0x2aa   : > { %v1069_v51 = vpop.permute.xlu1 %1068 }
 0x2ae   : > { %v1092_v54 = vpop.permute.xlu1 %1091 }
 0x2b2   : > { %v1097_v0 = vpop.permute.xlu1 %1096 }
 0x2b6   : > { %v1074_v3 = vpop.permute.xlu1 %1073 }
 0x2ba   : > { %v1102_v4 = vpop.permute.xlu1 %1101 }
 0x2c2   : > { %1707 = vset.pattern.permute.xlu0 %v1798_v52 }
 0x2c3   : > { %1078 = vperm.xlu0 %1707, %v1060_v19  }
 0x2dd   : > { %v2050_v20 = vpop.trf.xlu0 }
 0x2e1   : > { %v2052_v21 = vpop.trf.xlu0 }
 0x2e2   : > { %v1651_v22 = vpack.c.bf16 %v2052_v21, %v2050_v20 }
 0x2e4   : > { %1652 = vmatprep.subr.bf16.mxu0 %v1651_v22 }
 0x2e5   : > { %1654 = vmatpush3.bf16.msra.mxu0 %v1651_v22 }
 0x2e8   : > { %1611 = vmatmul.mubr.msk.f32.vlgmr.msra.gmra.mrb[8].mxu0 %vm921_vm2, %v894_v23 }
 0x2e9   : > { %1613 = vmatprep.mubr.msk.f32.mxu0 %vm921_vm2, %v895_v24 }
 0x2ec   : > { %1614 = vmatmul.mubr.msk.f32.gmra.mrb[10].mxu0 %vm921_vm2, %v896_v25  ;;  %v1107_v25 = vpop.permute.xlu1 %1106 }
 0x2ed   : > { %1624 = vmatprep.mubr.msk.f32.mxu0 %vm410_vm0, %v1133_v26 }
 0x342   : > { %v1079_v14 = vpop.permute.xlu0 %1078 }
 0x3bb   : > { %v1612_v30 = vpop.f32.mrb[8].mxu0 }
 0x3bc   : > { %v1006_v31 = vadd.f32 %v1612_v30, %v909_v28  ;;  %v1000_v32 = vpop.f32.mrb[9].mxu0 }
 0x3bd   : > { %v1001_v33 = vadd.f32 %v1000_v32, %v904_v27 }
 0x3be   : > { %v1031_v34 = vmul.f32 %v1006_v31, %v1006_v31 }
 0x3bf   : > { %v1019_v35 = vadd.f32 %v1006_v31, %v1001_v33  ;;  %v1030_v36 = vmul.f32 %v1001_v33, %v1001_v33  ;;  %v1615_v37 = vpop.f32.mrb[10].mxu0 }
 0x3c0   : > { %v1010_v39 = vpop.f32.mrb[11].mxu0  ;;  %v1016_v41 = vadd.f32 %v1615_v37, %v919_v38 }
 0x3c1   : > { %v1034_v40 = vadd.f32 %v1031_v34, %v1030_v36  ;;  %v1011_v42 = vadd.f32 %v1010_v39, %v914_v29 }
 0x3c2   : > { %v1033_v45 = vmul.f32 %v1016_v41, %v1016_v41 }
 0x3c3   : > { %v1020_v43 = vadd.f32 %v1019_v35, %v1011_v42  ;;  %v1032_v44 = vmul.f32 %v1011_v42, %v1011_v42 }
 0x3c5   : > { %v1021_v6 = vadd.f32 %v1020_v43, %v1016_v41  ;;  %v1035_v46 = vadd.f32 %v1034_v40, %v1032_v44 }
 0x3c7   : > { %v1022_v8 = vrot.slane %v1021_v6, 4  ;;  %v1036_v7 = vadd.f32 %v1035_v46, %v1033_v45 }
 0x3c9   : > { %v1023_v48 = vadd.f32 %v1022_v8, %v1021_v6  ;;  %v1037_v49 = vrot.slane %v1036_v7, 4 }
 0x3cb   : > { %v1024_v9 = vrot.slane %v1023_v48, 2  ;;  %v1038_v50 = vadd.f32 %v1037_v49, %v1036_v7  ;;  %v1134_v49 = vld [vmem:[%s2145_s9 + $0x8] sm:$0xff] }
 0x3cd   : > { %v1025_v10 = vadd.f32 %v1024_v9, %v1023_v48  ;;  %v1039_v11 = vrot.slane %v1038_v50, 2 }
 0x3cf   : > { %v1026_v12 = vrot.slane %v1025_v10, 1  ;;  %v1040_v13 = vadd.f32 %v1039_v11, %v1038_v50  ;;  %v1223_v50 = vpop.permute.xlu1 %1222 }
 0x3d1   : > { %v1027_v52 = vadd.f32 %v1026_v12, %v1025_v10  ;;  %v1041_v53 = vrot.slane %v1040_v13, 1 }
 0x3d3   : > { %v1029_v55 = vmul.f32 0.03125, %v1027_v52  ;;  %v1042_v56 = vadd.f32 %v1041_v53, %v1040_v13  ;;  %v1228_v13 = vpop.permute.xlu1 %1227 }
 0x3d5   : > { %v1043_v57 = vmul.f32 0.03125, %v1042_v56  ;;  %v1044_v58 = vmul.f32 %v1029_v55, %v1029_v55  ;;  %v1049_v59 = vsub.f32 %v1011_v42, %v1029_v55  ;;  %v1050_v60 = vsub.f32 %v1016_v41, %v1029_v55 }
 0x3d6   : > { %v1047_v61 = vsub.f32 %v1001_v33, %v1029_v55  ;;  %v1048_v62 = vsub.f32 %v1006_v31, %v1029_v55 }
 0x3d7   : > { %v1045_v63 = vsub.f32 %v1043_v57, %v1044_v58 }
 0x3d9   : > { %v1046_v1 = vmax.f32 %v1045_v63, 0.0 }
 0x3db   : > { %v1051_v2 = vadd.f32 1e-05, %v1046_v1 }
 0x3dd   : > { %1724 = vrsqrt.f32 %v1051_v2 }
 0x3e7   : > { %v1725_v5 = vpop.eup %1724 }
 0x3e8   : > { %v1055_v15 = vmul.f32 %v1725_v5, %v1049_v59  ;;  %v1056_v16 = vmul.f32 %v1725_v5, %v1050_v60  ;;  %v1053_v17 = vmul.f32 %v1725_v5, %v1047_v61  ;;  %v1054_v18 = vmul.f32 %v1725_v5, %v1048_v62 }
 0x3ea   : > { %v1083_v19 = vmul.f32 %v1074_v3, %v1055_v15  ;;  %v1084_v22 = vmul.f32 %v1079_v14, %v1056_v16  ;;  %v1081_v23 = vmul.f32 %v1064_v47, %v1053_v17  ;;  %v1082_v24 = vmul.f32 %v1069_v51, %v1054_v18 }
 0x3ec   : > { %v1112_v26 = vadd.f32 %v1107_v25, %v1084_v22  ;;  %v1109_v27 = vadd.f32 %v1092_v54, %v1081_v23  ;;  %v1110_v28 = vadd.f32 %v1097_v0, %v1082_v24  ;;  %v1111_v29 = vadd.f32 %v1102_v4, %v1083_v19 }
 0x3ee   : > { %v1120_v30 = vmul.f32 0.70710677, %v1112_v26  ;;  %v1117_v31 = vmul.f32 0.70710677, %v1109_v27  ;;  %v1118_v32 = vmul.f32 0.70710677, %v1110_v28 }
 0x3ef   : > { %v1119_v33 = vmul.f32 0.70710677, %v1111_v29  ;;  %v1116_v38 = vmul.f32 0.5, %v1112_v26  ;;  %v1113_v39 = vmul.f32 0.5, %v1109_v27  ;;  %v1114_v42 = vmul.f32 0.5, %v1110_v28 }
 0x3f0   : > { %1726 = verf.f32 %v1120_v30  ;;  %v1115_v45 = vmul.f32 0.5, %v1111_v29 }
 0x3f1   : > { %1728 = verf.f32 %v1117_v31 }
 0x3f2   : > { %1730 = verf.f32 %v1118_v32 }
 0x3f3   : > { %1732 = verf.f32 %v1119_v33 }
 0x3fa   : > { %v1727_v34 = vpop.eup %1726 }
 0x3fb   : > { %v1729_v35 = vpop.eup %1728  ;;  %v1128_v36 = vadd.f32 1.0, %v1727_v34 }
 0x3fc   : > { %v1731_v37 = vpop.eup %1730  ;;  %v1125_v40 = vadd.f32 1.0, %v1729_v35 }
 0x3fd   : > { %v1733_v41 = vpop.eup %1732  ;;  %v1126_v43 = vadd.f32 1.0, %v1731_v37  ;;  %v1132_v46 = vmul.f32 %v1128_v36, %v1116_v38 }
 0x3fe   : > { %v1129_v44 = vmul.f32 %v1125_v40, %v1113_v39  ;;  %v1127_v6 = vadd.f32 1.0, %v1733_v41 }
 0x3ff   : > { %v1130_v47 = vmul.f32 %v1126_v43, %v1114_v42 }
 0x400   : > { %v1131_v8 = vmul.f32 %v1127_v6, %v1115_v45 }
 0x401   : > { %v1655_v7 = vpack.c.bf16 %v1130_v47, %v1129_v44 }
 0x402   : > { %v1659_v48 = vpack.c.bf16 %v1132_v46, %v1131_v8 }
 0x403   : > { %1656 = vmatprep.subr.bf16.mxu0 %v1655_v7 }
 0x404   : > { %1658 = vmatpush3.bf16.msra.mxu0 %v1655_v7 }
 0x405   : > { %1660 = vmatprep.subr.bf16.mxu0 %v1659_v48 }
 0x408   : > { %1662 = vmatpush3.bf16.msra.mxu0 %v1659_v48 }
 0x40b   : > { %1625 = vmatmul.mubr.msk.f32.vlgmr.msra.gmra.mrb[12].mxu0 %vm410_vm0, %v1134_v49 }
 0x4de   : > { %v1626_v9 = vpop.f32.mrb[12].mxu0 }
 0x4df   : > { %v1207_v51 = vpop.f32.mrb[13].mxu0  ;;  %v1217_v11 = vadd.f32 %v1626_v9, %v2052_v21 }
 0x4e0   : > { %v1216_v10 = vadd.f32 %v1207_v51, %v2050_v20 }
 0x4e1   : > { %v1231_v52 = vadd.f32 %v1228_v13, %v1217_v11 }
 0x4e2   : > { %v1230_v12 = vadd.f32 %v1223_v50, %v1216_v10 }
 0x4e4   : > { %1232 = vxpose.xlu1.b32.start [1/2] (short) %v1230_v12, 128 }
 0x4e8   : > { %1233 = vxpose.xlu1.b32.end [2/2] (short) %v1231_v52, 128 }
 0x564   : > { %v1248_v53 = vpop.trf.xlu1 }
 0x565   : > { %1264 = vxpose.xlu0.b32.start [1/4] (short) (narrow) %v1248_v53, 16 }
 0x568   : > { %v1249_v54 = vpop.trf.xlu1 }
 0x569   : > { %1265 = vxpose.xlu0.b32.cont [2/4] (short) (narrow) %v1249_v54, 16 }
 0x56c   : > { %v1250_v55 = vpop.trf.xlu1 }
 0x56d   : > { %1266 = vxpose.xlu0.b32.cont [3/4] (short) (narrow) %v1250_v55, 16 }
 0x570   : > { %v1251_v56 = vpop.trf.xlu1 }
 0x571   : > { %1267 = vxpose.xlu0.b32.end [4/4] (short) (narrow) %v1251_v56, 16 }
 0x574   : > { %v1252_v57 = vpop.trf.xlu1 }
 0x575   : > { %1296 = vxpose.xlu1.b32.start [1/4] (short) (narrow) %v1252_v57, 16 }
 0x578   : > { %v1253_v58 = vpop.trf.xlu1 }
 0x579   : > { %1297 = vxpose.xlu1.b32.cont [2/4] (short) (narrow) %v1253_v58, 16 }
 0x57c   : > { %v1254_v20 = vpop.trf.xlu1 }
 0x57d   : > { %1298 = vxpose.xlu1.b32.cont [3/4] (short) (narrow) %v1254_v20, 16 }
 0x580   : > { %v1255_v21 = vpop.trf.xlu1 }
 0x581   : > { %1299 = vxpose.xlu1.b32.end [4/4] (short) (narrow) %v1255_v21, 16 }
 0x584   : > { %v1256_v59 = vpop.trf.xlu1 }
 0x585   : > { %1328 = vxpose.xlu0.b32.start [1/4] (short) (narrow) %v1256_v59, 16 }
 0x588   : > { %v1257_v60 = vpop.trf.xlu1 }
 0x589   : > { %1329 = vxpose.xlu0.b32.cont [2/4] (short) (narrow) %v1257_v60, 16 }
 0x58c   : > { %v1258_v61 = vpop.trf.xlu1 }
 0x58d   : > { %1330 = vxpose.xlu0.b32.cont [3/4] (short) (narrow) %v1258_v61, 16 }
 0x590   : > { %v1259_v62 = vpop.trf.xlu1 }
 0x591   : > { %1331 = vxpose.xlu0.b32.end [4/4] (short) (narrow) %v1259_v62, 16 }
 0x594   : > { %v1260_v63 = vpop.trf.xlu1 }
 0x595   : > { %1360 = vxpose.xlu0.b32.start [1/4] (short) (narrow) %v1260_v63, 16 }
 0x598   : > { %v1261_v0 = vpop.trf.xlu1 }
 0x599   : > { %1361 = vxpose.xlu0.b32.cont [2/4] (short) (narrow) %v1261_v0, 16 }
 0x59c   : > { %v1262_v1 = vpop.trf.xlu1 }
 0x59d   : > { %1362 = vxpose.xlu0.b32.cont [3/4] (short) (narrow) %v1262_v1, 16 }
 0x5a0   : > { %v1263_v2 = vpop.trf.xlu1 }
 0x5a1   : > { %1363 = vxpose.xlu0.b32.end [4/4] (short) (narrow) %v1263_v2, 16 }
 0x5e5   : > { %v1280_v3 = vpop.trf.xlu0 }
 0x5e6   : > { %1392 = vst.msk [vmem:[%s382_s15] sm:$0xff] %vm410_vm0, %v1280_v3 }
 0x5e9   : > { %v1281_v4 = vpop.trf.xlu0 }
 0x5ea   : > { %1393 = vst.msk [vmem:[%s382_s15 + $0x8] sm:$0xff] %vm410_vm0, %v1281_v4 }
 0x5f5   : > { %v1312_v5 = vpop.trf.xlu1 }
 0x5f6   : > { %1394 = vst.msk [vmem:[%s382_s15 + $0x10] sm:$0xff] %vm410_vm0, %v1312_v5 }
 0x5f9   : > { %v1313_v14 = vpop.trf.xlu1 }
 0x5fa   : > { %1395 = vst.msk [vmem:[%s382_s15 + $0x18] sm:$0xff] %vm410_vm0, %v1313_v14 }
 0x605   : > { %v1344_v15 = vpop.trf.xlu0 }
 0x606   : > { %1396 = vst.msk [vmem:[%s382_s15 + $0x20] sm:$0xff] %vm410_vm0, %v1344_v15 }
 0x609   : > { %v1345_v16 = vpop.trf.xlu0 }
 0x60a   : > { %1397 = vst.msk [vmem:[%s382_s15 + $0x28] sm:$0xff] %vm410_vm0, %v1345_v16 }
 0x615   : > { %v1376_v17 = vpop.trf.xlu0 }
 0x616   : > { %1398 = vst.msk [vmem:[%s382_s15 + $0x30] sm:$0xff] %vm410_vm0, %v1376_v17 }
 0x619   : > { %v1377_v18 = vpop.trf.xlu0 }
 0x61a   : > { %1399 = vst.msk [vmem:[%s382_s15 + $0x38] sm:$0xff] %vm410_vm0, %v1377_v18 }
 0x61b   : > { %1747 = shalt.err (!%p1744_p3)
}
 0x61c   : > { %s1748_s13 = scalar_lea.hbm %s2090_s29, 1024  ;;  %s1752_s25 = scalar_lea.hbm %s2147_s11, 2048 }
 0x61d   : > { %p1749_p4 = scmp.ne.s32.totalorder %s2090_s29, %s1748_s13  ;;  %p1753_p9 = scmp.lt.u32.totalorder %s2090_s29, %s2147_s11 }
 0x61e   : > { %p1754_p10 = scmp.lt.u32.totalorder %s1752_s25, %s1748_s13  ;;  %p1756_p12 = scmp.lt.u32.totalorder %s1748_s13, %s2090_s29 }
 0x61f   : > { %p1750_p7 = pnand %p1749_p4, %p1900_p5 }
 0x620   : > { %p1755_p11 = por %p1754_p10, %p1753_p9 }
 0x621   : > { %p1751_p8 = pneg %p1750_p7 }
 0x622   : > { %p1757_p13 = por %p1756_p12, %p1755_p11 }
 0x624   : > { %p1758_p0 = pnand %p1757_p13, %p1751_p8 }
 0x626   : > { %1761 = shalt.err (!%p1758_p0)
}
 0x627   : > { %s1800_s21 = smov 128   ;;  %s1801_s16 = smov 8  }
 0x628   : > { %1663 = dma.vmem_to_hbm [thread:$0]  (%p1900_p5), %s2092_s22, 1024, %s2090_s29, %s2095_s30, %s1800_s21, %s1800_s21, %s1801_s16  }
 0x629 PF: > { %p1669_p1 = scmp.ge.s32.totalorder %s1796_s20, 2  ;;  %s1430_s15 = sand.u32 1, %s1784_s17  }
 0x62a   : > { %s1431_s13 = scalar_lea.sflag [#allocation3], %s1430_s15 }
 0x62b   : > { %p1666_p2 = pnand %p1669_p1, %p1904_p6 }
 0x62d   : > { %1779 = dma.done.wait (!%p1666_p2), %s1431_s13, 1024  }
 0x62e   : > { %1781 = vsyncadd (!%p1666_p2), %s1431_s13, 4294966272  ;;  %p21_p3 = scmp.ge.s32.totalorder %s1887_s23, 4   ;;  %s2150_s17 = smov %s1788_s18 }
 0x62f   : > { %s2151_s18 = smov %s1792_s19  ;;  %s2152_s19 = smov %s1898_s26 }
 0x630   : > { %s2153_s20 = smov %s1887_s23  ;;  %23 = sbr.rel (!%p21_p3) target bundleno = 3 (0x3), region = 99 }
 0x637   :  { %1436 = vsyncpa [#allocation3], 1 }
 0x638   :  { %1438 = vsyncpa [#allocation3 + $0x1], 1 }

// kernel: tpu_custom_call.1
= control target key start
LH: loop header
LB: loop body
LE: loop exit
PB: predicated region body
PF: predicated region fallthrough
CT: control target
= control target key end

     0   :  { %16 = vsyncpa [#allocation3], 0  ;;  %s2136_s0 = inlined_call_operand.vmem [shape: f32[8,16,32], index: 0, kind: input, shape index: {}]   ;;  %s2137_s1 = inlined_call_operand.vmem [shape: f32[32,64], index: 1, kind: input, shape index: {}]   ;;  %s2138_s2 = inlined_call_operand.vmem [shape: f32[1,64], index: 2, kind: input, shape index: {}]   ;;  %s2139_s3 = inlined_call_operand.vmem [shape: f32[64,32], index: 3, kind: input, shape index: {}]   ;;  %s2140_s4 = inlined_call_operand.vmem [shape: f32[1,32], index: 4, kind: input, shape index: {}]   ;;  %s2141_s5 = inlined_call_operand.vmem [shape: f32[32,16], index: 5, kind: input, shape index: {}]   ;;  %s2142_s6 = inlined_call_operand.vmem [shape: f32[32,1], index: 6, kind: input, shape index: {}]   ;;  %s2143_s7 = inlined_call_operand.vmem [shape: f32[32,1], index: 7, kind: input, shape index: {}]   ;;  %s2144_s8 = inlined_call_operand.vmem [shape: f32[32,1], index: 8, kind: input, shape index: {}]   ;;  %s2145_s9 = inlined_call_operand.vmem [shape: f32[16,32], index: 9, kind: input, shape index: {}]   ;;  %s2146_s10 = inlined_call_operand.vmem [shape: f32[16,1], index: 10, kind: input, shape index: {}]   ;;  %s2147_s11 = inlined_call_operand.hbm [shape: f32[8,16,32], index: 11, kind: output, shape index: {}]  }
   0x1   :  { %18 = vsyncpa [#allocation3 + $0x1], 0  ;;  %s1862_s17 = smov 0   ;;  %s1864_s18 = smov 0  }
   0x2   :  { %s1866_s19 = smov 0   ;;  %s1868_s20 = smov 0  }
   0x3 LB: > { %s1883_s21 = sadd.s32 4294967295, %s1796_s20   ;;  %s1477_s22 = sadd.s32 4294967294, %s1796_s20   ;;  %s1796_s20 = sphi %s1868_s20, %s2153_s20   ;;  %s1792_s19 = sphi %s1866_s19, %s2152_s19   ;;  %s1788_s18 = sphi %s1864_s18, %s2151_s18   ;;  %s1784_s17 = sphi %s1862_s17, %s2150_s17  }
   0x4   : > { %s1887_s23 = sadd.s32 1, %s1796_s20   ;;  %s267_s24 = sadd.s32 1, %s1792_s19 }
   0x5   : > { %s264_s25 = ssub.s32 %s1796_s20, %s1887_s23  ;;  %p277_p0 = scmp.ne.s32.totalorder %s1792_s19, %s1788_s18 }
   0x6   : > { %p265_p1 = scmp.eq.s32.totalorder %s264_s25, 0  ;;  %p278_p2 = scmp.eq.s32.totalorder %s1883_s21, 1 }
   0x7   : > { %p283_p3 = scmp.ne.s32.totalorder %s1788_s18, %s1784_s17  ;;  %p284_p4 = scmp.eq.s32.totalorder %s1477_s22, 1 }
   0x8   : > { %s1898_s26 = scalar_select %p265_p1, %s1792_s19, %s267_s24  }
   0x9   : > { %p1900_p5 = por %p278_p2, %p277_p0  ;;  %p1904_p6 = por %p284_p4, %p283_p3 }
   0xa   : > { %p1480_p7 = scmp.ge.s32.totalorder %s1796_s20, 1  ;;  %p342_p8 = scmp.lt.s32.totalorder %s1796_s20, 3 }
   0xc   : > { %p343_p9 = pnand %p1480_p7, %p342_p8 }
   0xd   : > { %v399_v0 = vld [vmem:[%s2137_s1] sm:$0xff] (!%p343_p9)  ;;  %v400_v1 = vld [vmem:[%s2137_s1 + $0x8] sm:$0xff] (!%p343_p9)  ;;  %v401_v2 = vld [vmem:[%s2137_s1 + $0x10] sm:$0xff] (!%p343_p9)  ;;  %s1482_s16 = sshll.u32 (!%p343_p9), %s1883_s21, 2  ;;  %vm410_vm0 = vcmask (!%p343_p9), 261120   ;;  %vm595_vm1 = vcmask (!%p343_p9), 523264  }
   0xe   : > { %346 = sbr.rel (%p343_p9) target bundleno = 1577 (0x629), region = 64  ;;  %v1627_v3 = vpack.c.bf16 (!%p343_p9), %v400_v1, %v399_v0  ;;  %v402_v4 = vld [vmem:[%s2137_s1 + $0x18] sm:$0xff] (!%p343_p9)  ;;  %p384_p10 = scmp.lt.s32.totalorder (!%p343_p9), %s1482_s16, 7  ;;  %v580_v14 = vld [vmem:[%s2139_s3] sm:$0xff] (!%p343_p9)  ;;  %v581_v15 = vld [vmem:[%s2139_s3 + $0x8] sm:$0xff] (!%p343_p9)  ;;  %vm921_vm2 = vcmask (!%p343_p9), 130048  }
   0xf   : > { %v1631_v5 = vpack.c.bf16 (!%p343_p9), %v402_v4, %v401_v2  ;;  %v1635_v16 = vpack.c.bf16 (!%p343_p9), %v581_v15, %v580_v14  ;;  %v582_v17 = vld [vmem:[%s2139_s3 + $0x10] sm:$0xff] (!%p343_p9)  ;;  %v583_v18 = vld [vmem:[%s2139_s3 + $0x18] sm:$0xff] (!%p343_p9)  ;;  %v584_v20 = vld [vmem:[%s2139_s3 + $0x20] sm:$0xff] (!%p343_p9)  ;;  %s380_s13 = sand.u32 (!%p343_p9), 1, %s1788_s18  }
  0x10   : > { %1628 = vmatprep.subr.bf16.mxu0 (!%p343_p9), %v1627_v3  ;;  %v1639_v19 = vpack.c.bf16 (!%p343_p9), %v583_v18, %v582_v17  ;;  %v585_v21 = vld [vmem:[%s2139_s3 + $0x28] sm:$0xff] (!%p343_p9)  ;;  %v586_v23 = vld [vmem:[%s2139_s3 + $0x30] sm:$0xff] (!%p343_p9)  ;;  %v587_v24 = vld [vmem:[%s2139_s3 + $0x38] sm:$0xff] (!%p343_p9)  ;;  %s1481_s14 = sshll.u32 (!%p343_p9), %s380_s13, 6  ;;  %s2095_s30 = scalar_lea.sflag (!%p343_p9), [#allocation3], %s380_s13 }
  0x11   : > { %1630 = vmatpush3.bf16.msra.mxu0 (!%p343_p9), %v1627_v3  ;;  %1636 = vmatprep.subr.bf16.mxu1 (!%p343_p9), %v1635_v16  ;;  %v1643_v22 = vpack.c.bf16 (!%p343_p9), %v585_v21, %v584_v20  ;;  %v1647_v25 = vpack.c.bf16 (!%p343_p9), %v587_v24, %v586_v23  ;;  %v1485_v26 = vld [vmem:[%s2138_s2] ss:$0 sm:$0xff] (!%p343_p9)  ;;  %s382_s15 = scalar_lea.vmem (!%p343_p9), [#allocation2], %s1481_s14 }
  0x12   : > { %1632 = vmatprep.subr.bf16.mxu0 (!%p343_p9), %v1631_v5  ;;  %1638 = vmatpush3.bf16.msra.mxu1 (!%p343_p9), %v1635_v16  ;;  %s1415_s22 = sshll.u32 (!%p343_p9), %s382_s15, 4  ;;  %s2092_s22 = int_to_ptr.vmem [resolvable:$true] %s1415_s22 }
  0x13   : > { %1640 = vmatprep.subr.bf16.mxu1 (!%p343_p9), %v1639_v19 }
  0x15   : > { %s2155_s16 = smov (!%p384_p10, %s1482_s16), 7  ;;  %1634 = vmatpush3.bf16.msra.mxu0 %v1631_v5 }
  0x16   : > { %s1515_s25 = sshll.u32 %s2155_s16, 4  ;;  %1642 = vmatpush3.bf16.msra.mxu1 %v1639_v19  ;;  %s1517_s16 = sshll.u32 %s1883_s21, 10 }
  0x17   : > { %s388_s12 = scalar_lea.vmem %s2136_s0, %s1515_s25  ;;  %1644 = vmatprep.subr.bf16.mxu1 %v1643_v22  ;;  %s2090_s29 = scalar_lea.hbm %s2147_s11, %s1517_s16 }
  0x18   : > { %v1926_v6 = vld [vmem:[%s388_s12] sm:$0xff]  ;;  %v1930_v7 = vld [vmem:[%s388_s12 + $0x8] sm:$0xff]  ;;  %v1932_v8 = vld [vmem:[%s388_s12 + $0x10] sm:$0xff]  ;;  %s1734_s21 = scalar_lea.vmem %s2092_s22, 1024 }
  0x19   : > { %1566 = vmatprep.mubr.msk.f32.mxu0 %vm410_vm0, %v1926_v6  ;;  %v1938_v9 = vld [vmem:[%s388_s12 + $0x18] sm:$0xff]  ;;  %v1940_v10 = vld [vmem:[%s388_s12 + $0x20] sm:$0xff]  ;;  %v1946_v11 = vld [vmem:[%s388_s12 + $0x28] sm:$0xff]  ;;  %p1735_p11 = scmp.ne.s32.totalorder %s2092_s22, %s1734_s21 }
  0x1a   : > { %1567 = vmatmul.mubr.msk.f32.vlgmr.msra.gmra.mrb[0].mxu0 %vm410_vm0, %v1930_v7  ;;  %v1948_v12 = vld [vmem:[%s388_s12 + $0x30] sm:$0xff]  ;;  %v1954_v13 = vld [vmem:[%s388_s12 + $0x38] sm:$0xff]  ;;  %1646 = vmatpush3.bf16.msra.mxu1 %v1643_v22  ;;  %s1799_s12 = smov [#allocation2]  }
  0x1b   : > { %1569 = vmatprep.mubr.msk.f32.mxu0 %vm410_vm0, %v1932_v8  ;;  %1648 = vmatprep.subr.bf16.mxu1 %v1647_v25  ;;  %p1736_p12 = pnand %p1735_p11, %p1900_p5  ;;  %s1738_s14 = sshll.u32 %s1799_s12, 4  ;;  %s1739_s14 = int_to_ptr.vmem [resolvable:$false] %s1738_s14 }
  0x1c   : > { %s1740_s16 = scalar_lea.vmem %s1739_s14, 2048  ;;  %p1741_p0 = scmp.lt.s32.totalorder %s2092_s22, %s1739_s14 }
  0x1d   : > { %p1737_p13 = pneg %p1736_p12  ;;  %p1742_p1 = scmp.lt.s32.totalorder %s1740_s16, %s1734_s21 }
  0x1e   : > { %1570 = vmatmul.mubr.msk.f32.gmra.mrb[2].mxu0 %vm410_vm0, %v1938_v9  ;;  %1650 = vmatpush3.bf16.msra.mxu1 %v1647_v25 }
  0x1f   : > { %1572 = vmatprep.mubr.msk.f32.mxu0 %vm410_vm0, %v1940_v10  ;;  %p1743_p2 = por %p1742_p1, %p1741_p0 }
  0x21   : > { %p1744_p3 = pnand %p1743_p2, %p1737_p13 }
  0x22   : > { %1573 = vmatmul.mubr.msk.f32.gmra.mrb[4].mxu0 %vm410_vm0, %v1946_v11 }
  0x23   : > { %1575 = vmatprep.mubr.msk.f32.mxu0 %vm410_vm0, %v1948_v12 }
  0x26   : > { %1576 = vmatmul.mubr.msk.f32.gmra.mrb[6].mxu0 %vm410_vm0, %v1954_v13 }
  0xed   : > { %v1568_v27 = vpop.f32.mrb[0].mxu0 }
  0xee   : > { %v507_v28 = vadd.f32 %v1568_v27, %v1485_v26  ;;  %v501_v29 = vpop.f32.mrb[1].mxu0  ;;  %v1494_v27 = vld [vmem:[%s2140_s4] ss:$0 sm:$0xff] }
  0xef   : > { %v502_v30 = vadd.f32 %v1485_v26, %v501_v29 }
  0xf0   : > { %v549_v31 = vmul.f32 0.70710677, %v507_v28  ;;  %v541_v56 = vmul.f32 0.5, %v507_v28 }
  0xf1   : > { %v548_v32 = vmul.f32 0.70710677, %v502_v30  ;;  %v1571_v33 = vpop.f32.mrb[2].mxu0  ;;  %v540_v54 = vmul.f32 0.5, %v502_v30 }
  0xf2   : > { %1708 = verf.f32 %v549_v31  ;;  %v517_v34 = vadd.f32 %v1571_v33, %v1485_v26  ;;  %v511_v35 = vpop.f32.mrb[3].mxu0 }
  0xf3   : > { %1710 = verf.f32 %v548_v32  ;;  %v512_v36 = vadd.f32 %v1485_v26, %v511_v35 }
  0xf4   : > { %v551_v37 = vmul.f32 0.70710677, %v517_v34  ;;  %v543_v61 = vmul.f32 0.5, %v517_v34 }
  0xf5   : > { %v550_v38 = vmul.f32 0.70710677, %v512_v36  ;;  %v1574_v39 = vpop.f32.mrb[4].mxu0  ;;  %v542_v63 = vmul.f32 0.5, %v512_v36 }
  0xf6   : > { %1712 = verf.f32 %v551_v37  ;;  %v527_v40 = vadd.f32 %v1574_v39, %v1485_v26  ;;  %v521_v41 = vpop.f32.mrb[5].mxu0 }
  0xf7   : > { %1714 = verf.f32 %v550_v38  ;;  %v522_v42 = vadd.f32 %v1485_v26, %v521_v41 }
  0xf8   : > { %v553_v43 = vmul.f32 0.70710677, %v527_v40  ;;  %v545_v1 = vmul.f32 0.5, %v527_v40 }
  0xf9   : > { %v552_v44 = vmul.f32 0.70710677, %v522_v42  ;;  %v1577_v45 = vpop.f32.mrb[6].mxu0  ;;  %v544_v4 = vmul.f32 0.5, %v522_v42 }
  0xfa   : > { %1716 = verf.f32 %v553_v43  ;;  %v537_v46 = vadd.f32 %v1577_v45, %v1485_v26  ;;  %v531_v47 = vpop.f32.mrb[7].mxu0 }
  0xfb   : > { %1718 = verf.f32 %v552_v44  ;;  %v532_v48 = vadd.f32 %v1485_v26, %v531_v47 }
  0xfc   : > { %v1709_v49 = vpop.eup %1708  ;;  %v555_v50 = vmul.f32 0.70710677, %v537_v46  ;;  %v547_v18 = vmul.f32 0.5, %v537_v46 }
  0xfd   : > { %v1711_v51 = vpop.eup %1710  ;;  %v565_v52 = vadd.f32 1.0, %v1709_v49  ;;  %v554_v53 = vmul.f32 0.70710677, %v532_v48  ;;  %v546_v21 = vmul.f32 0.5, %v532_v48 }
  0xfe   : > { %v564_v55 = vadd.f32 1.0, %v1711_v51  ;;  %1720 = verf.f32 %v555_v50 }
  0xff   : > { %1722 = verf.f32 %v554_v53  ;;  %v573_v60 = vmul.f32 %v565_v52, %v541_v56  ;;  %v1798_v52 = vmov 0   ;;  %v898_v53 = vld [vmem:[%s2142_s6 + $0x8] sm:$0xff] }
 0x100   : > { %v1713_v57 = vpop.eup %1712  ;;  %v572_v58 = vmul.f32 %v564_v55, %v540_v54  ;;  %v899_v55 = vld [vmem:[%s2142_s6 + $0x10] sm:$0xff] }
 0x101   : > { %v1715_v59 = vpop.eup %1714  ;;  %v567_v62 = vadd.f32 1.0, %v1713_v57 }
 0x102   : > { %v566_v0 = vadd.f32 1.0, %v1715_v59  ;;  %1594 = vmatprep.mubr.msk.f32.mxu1 %vm595_vm1, %v572_v58  ;;  %v900_v58 = vld [vmem:[%s2142_s6 + $0x18] sm:$0xff] }
 0x103   : > { %1595 = vmatmul.mubr.msk.f32.vlgmr.msra.gmra.mrb[0].mxu1 %vm595_vm1, %v573_v60  ;;  %v575_v14 = vmul.f32 %v567_v62, %v543_v61  ;;  %v1057_v60 = vld [vmem:[%s2143_s7] sm:$0xff]  ;;  %v1058_v61 = vld [vmem:[%s2143_s7 + $0x8] sm:$0xff] }
 0x104   : > { %v1717_v2 = vpop.eup %1716  ;;  %v574_v3 = vmul.f32 %v566_v0, %v542_v63  ;;  %v1085_v63 = vld [vmem:[%s2144_s8] sm:$0xff] }
 0x105   : > { %v1719_v5 = vpop.eup %1718  ;;  %v569_v15 = vadd.f32 1.0, %v1717_v2  ;;  %v1086_v2 = vld [vmem:[%s2144_s8 + $0x8] sm:$0xff] }
 0x106   : > { %v568_v16 = vadd.f32 1.0, %v1719_v5  ;;  %1597 = vmatprep.mubr.msk.f32.mxu1 %vm595_vm1, %v574_v3  ;;  %v1087_v5 = vld [vmem:[%s2144_s8 + $0x10] sm:$0xff] }
 0x107   : > { %v577_v17 = vmul.f32 %v569_v15, %v545_v1  ;;  %1598 = vmatmul.mubr.msk.f32.gmra.mrb[2].mxu1 %vm595_vm1, %v575_v14  ;;  %v1088_v15 = vld [vmem:[%s2144_s8 + $0x18] sm:$0xff] }
 0x108   : > { %v1721_v19 = vpop.eup %1720  ;;  %v576_v20 = vmul.f32 %v568_v16, %v544_v4  ;;  %v1059_v4 = vld [vmem:[%s2143_s7 + $0x10] sm:$0xff] }
 0x109   : > { %v1723_v22 = vpop.eup %1722  ;;  %v571_v23 = vadd.f32 1.0, %v1721_v19  ;;  %v1060_v19 = vld [vmem:[%s2143_s7 + $0x18] sm:$0xff] }
 0x10a   : > { %v570_v24 = vadd.f32 1.0, %v1723_v22  ;;  %1600 = vmatprep.mubr.msk.f32.mxu1 %vm595_vm1, %v576_v20 }
 0x10b   : > { %v579_v25 = vmul.f32 %v571_v23, %v547_v18  ;;  %1601 = vmatmul.mubr.msk.f32.gmra.mrb[4].mxu1 %vm595_vm1, %v577_v17  ;;  %v1218_v17 = vld [vmem:[%s2146_s10] sm:$0xff]  ;;  %v1219_v18 = vld [vmem:[%s2146_s10 + $0x8] sm:$0xff] }
 0x10c   : > { %v578_v26 = vmul.f32 %v570_v24, %v546_v21  ;;  %v894_v23 = vld [vmem:[%s2141_s5 + $0x8] sm:$0xff]  ;;  %v895_v24 = vld [vmem:[%s2141_s5 + $0x10] sm:$0xff] }
 0x10e   : > { %1603 = vmatprep.mubr.msk.f32.mxu1 %vm595_vm1, %v578_v26  ;;  %v1133_v26 = vld [vmem:[%s2145_s9] sm:$0xff] }
 0x10f   : > { %1604 = vmatmul.mubr.msk.f32.gmra.mrb[6].mxu1 %vm595_vm1, %v579_v25  ;;  %v896_v25 = vld [vmem:[%s2141_s5 + $0x18] sm:$0xff] }
 0x1d6   : > { %v1596_v28 = vpop.f32.mrb[0].mxu1 }
 0x1d7   : > { %v686_v29 = vpop.f32.mrb[1].mxu1  ;;  %v692_v31 = vadd.f32 %v1596_v28, %v1494_v27 }
 0x1d8   : > { %v687_v30 = vadd.f32 %v1494_v27, %v686_v29 }
 0x1d9   : > { %v726_v38 = vadd.f32 %v692_v31, %v1930_v7 }
 0x1da   : > { %v1599_v32 = vpop.f32.mrb[2].mxu1  ;;  %v725_v33 = vadd.f32 %v687_v30, %v1926_v6 }
 0x1db   : > { %v696_v34 = vpop.f32.mrb[3].mxu1  ;;  %v702_v36 = vadd.f32 %v1599_v32, %v1494_v27 }
 0x1dc   : > { %v697_v35 = vadd.f32 %v1494_v27, %v696_v34  ;;  %733 = vxpose.xlu0.b32.start [1/2] (short) (narrow) %v725_v33, 32 }
 0x1dd   : > { %v728_v42 = vadd.f32 %v702_v36, %v1938_v9 }
 0x1de   : > { %v727_v37 = vadd.f32 %v697_v35, %v1932_v8  ;;  %v1602_v39 = vpop.f32.mrb[4].mxu1 }
 0x1df   : > { %v706_v40 = vpop.f32.mrb[5].mxu1  ;;  %v712_v45 = vadd.f32 %v1602_v39, %v1494_v27 }
 0x1e0   : > { %765 = vxpose.xlu1.b32.start [1/2] (short) (narrow) %v727_v37, 32  ;;  %734 = vxpose.xlu0.b32.end [2/2] (short) (narrow) %v726_v38, 32  ;;  %v707_v41 = vadd.f32 %v1494_v27, %v706_v40 }
 0x1e1   : > { %v730_v47 = vadd.f32 %v712_v45, %v1946_v11 }
 0x1e2   : > { %v1605_v43 = vpop.f32.mrb[6].mxu1  ;;  %v729_v6 = vadd.f32 %v707_v41, %v1940_v10  ;;  %v893_v10 = vld [vmem:[%s2141_s5] sm:$0xff] }
 0x1e3   : > { %v716_v44 = vpop.f32.mrb[7].mxu1  ;;  %v722_v8 = vadd.f32 %v1605_v43, %v1494_v27  ;;  %1610 = vmatprep.mubr.msk.f32.mxu0 %vm921_vm2, %v893_v10 }
 0x1e4   : > { %766 = vxpose.xlu1.b32.end [2/2] (short) (narrow) %v728_v42, 32  ;;  %v717_v46 = vadd.f32 %v1494_v27, %v716_v44 }
 0x1e5   : > { %v732_v48 = vadd.f32 %v722_v8, %v1954_v13  ;;  %v897_v13 = vld [vmem:[%s2142_s6] sm:$0xff] }
 0x1e6   : > { %v731_v7 = vadd.f32 %v717_v46, %v1948_v12 }
 0x1e9   : > { %797 = vxpose.xlu0.b32.start [1/2] (short) (narrow) %v729_v6, 32 }
 0x1ed   : > { %798 = vxpose.xlu0.b32.end [2/2] (short) (narrow) %v730_v47, 32  ;;  %829 = vxpose.xlu1.b32.start [1/2] (short) (narrow) %v731_v7, 32 }
 0x1f1   : > { %830 = vxpose.xlu1.b32.end [2/2] (short) (narrow) %v732_v48, 32 }
 0x20f   : > { %1706 = vset.pattern.permute.xlu1 %v1798_v52 }
 0x217   : > { %903 = vperm.xlu1 %1706, %v897_v13  }
 0x21b   : > { %908 = vperm.xlu1 %1706, %v898_v53  }
 0x21f   : > { %913 = vperm.xlu1 %1706, %v899_v55  }
 0x223   : > { %918 = vperm.xlu1 %1706, %v900_v58  }
 0x227   : > { %1063 = vperm.xlu1 %1706, %v1057_v60  }
 0x22b   : > { %1068 = vperm.xlu1 %1706, %v1058_v61  }
 0x22f   : > { %1091 = vperm.xlu1 %1706, %v1085_v63  }
 0x233   : > { %1096 = vperm.xlu1 %1706, %v1086_v2  }
 0x237   : > { %1073 = vperm.xlu1 %1706, %v1059_v4  }
 0x23b   : > { %1101 = vperm.xlu1 %1706, %v1087_v5  }
 0x23f   : > { %1106 = vperm.xlu1 %1706, %v1088_v15  }
 0x243   : > { %1222 = vperm.xlu1 %1706, %v1218_v17  }
 0x247   : > { %1227 = vperm.xlu1 %1706, %v1219_v18  }
 0x25c   : > { %v749_v49 = vpop.trf.xlu0 }
 0x25d   : > { %861 = vxpose.xlu0.b32.start [1/16] (narrow) %v749_v49, 16 }
 0x260   : > { %v750_v9 = vpop.trf.xlu0  ;;  %v781_v51 = vpop.trf.xlu1 }
 0x261   : > { %862 = vxpose.xlu0.b32.cont [2/16] (narrow) %v750_v9, 16 }
 0x264   : > { %v751_v50 = vpop.trf.xlu0  ;;  %v782_v12 = vpop.trf.xlu1 }
 0x265   : > { %863 = vxpose.xlu0.b32.cont [3/16] (narrow) %v751_v50, 16 }
 0x268   : > { %v752_v11 = vpop.trf.xlu0  ;;  %v783_v54 = vpop.trf.xlu1 }
 0x269   : > { %864 = vxpose.xlu0.b32.cont [4/16] (narrow) %v752_v11, 16 }
 0x26c   : > { %v813_v56 = vpop.trf.xlu0  ;;  %v784_v57 = vpop.trf.xlu1 }
 0x26d   : > { %865 = vxpose.xlu0.b32.cont [5/16] (narrow) %v781_v51, 16 }
 0x270   : > { %v814_v59 = vpop.trf.xlu0  ;;  %v845_v0 = vpop.trf.xlu1 }
 0x271   : > { %866 = vxpose.xlu0.b32.cont [6/16] (narrow) %v782_v12, 16 }
 0x274   : > { %v815_v62 = vpop.trf.xlu0  ;;  %v846_v3 = vpop.trf.xlu1 }
 0x275   : > { %867 = vxpose.xlu0.b32.cont [7/16] (narrow) %v783_v54, 16 }
 0x278   : > { %v816_v1 = vpop.trf.xlu0  ;;  %v847_v14 = vpop.trf.xlu1 }
 0x279   : > { %868 = vxpose.xlu0.b32.cont [8/16] (narrow) %v784_v57, 16 }
 0x27c   : > { %v848_v16 = vpop.trf.xlu1 }
 0x27d   : > { %869 = vxpose.xlu0.b32.cont [9/16] (narrow) %v813_v56, 16 }
 0x281   : > { %870 = vxpose.xlu0.b32.cont [10/16] (narrow) %v814_v59, 16 }
 0x285   : > { %871 = vxpose.xlu0.b32.cont [11/16] (narrow) %v815_v62, 16 }
 0x289   : > { %872 = vxpose.xlu0.b32.cont [12/16] (narrow) %v816_v1, 16 }
 0x28d   : > { %873 = vxpose.xlu0.b32.cont [13/16] (narrow) %v845_v0, 16 }
 0x291   : > { %874 = vxpose.xlu0.b32.cont [14/16] (narrow) %v846_v3, 16 }
 0x295   : > { %875 = vxpose.xlu0.b32.cont [15/16] (narrow) %v847_v14, 16 }
 0x296   : > { %v904_v27 = vpop.permute.xlu1 %903 }
 0x299   : > { %876 = vxpose.xlu0.b32.end [16/16] (narrow) %v848_v16, 16 }
 0x29a   : > { %v909_v28 = vpop.permute.xlu1 %908 }
 0x29e   : > { %v914_v29 = vpop.permute.xlu1 %913 }
 0x2a2   : > { %v919_v38 = vpop.permute.xlu1 %918 }
 0x2a6   : > { %v1064_v47 = vpop.permute.xlu1 %1063 }
 0x2aa   : > { %v1069_v51 = vpop.permute.xlu1 %1068 }
 0x2ae   : > { %v1092_v54 = vpop.permute.xlu1 %1091 }
 0x2b2   : > { %v1097_v0 = vpop.permute.xlu1 %1096 }
 0x2b6   : > { %v1074_v3 = vpop.permute.xlu1 %1073 }
 0x2ba   : > { %v1102_v4 = vpop.permute.xlu1 %1101 }
 0x2c2   : > { %1707 = vset.pattern.permute.xlu0 %v1798_v52 }
 0x2c3   : > { %1078 = vperm.xlu0 %1707, %v1060_v19  }
 0x2dd   : > { %v2050_v20 = vpop.trf.xlu0 }
 0x2e1   : > { %v2052_v21 = vpop.trf.xlu0 }
 0x2e2   : > { %v1651_v22 = vpack.c.bf16 %v2052_v21, %v2050_v20 }
 0x2e4   : > { %1652 = vmatprep.subr.bf16.mxu0 %v1651_v22 }
 0x2e5   : > { %1654 = vmatpush3.bf16.msra.mxu0 %v1651_v22 }
 0x2e8   : > { %1611 = vmatmul.mubr.msk.f32.vlgmr.msra.gmra.mrb[8].mxu0 %vm921_vm2, %v894_v23 }
 0x2e9   : > { %1613 = vmatprep.mubr.msk.f32.mxu0 %vm921_vm2, %v895_v24 }
 0x2ec   : > { %1614 = vmatmul.mubr.msk.f32.gmra.mrb[10].mxu0 %vm921_vm2, %v896_v25  ;;  %v1107_v25 = vpop.permute.xlu1 %1106 }
 0x2ed   : > { %1624 = vmatprep.mubr.msk.f32.mxu0 %vm410_vm0, %v1133_v26 }
 0x342   : > { %v1079_v14 = vpop.permute.xlu0 %1078 }
 0x3bb   : > { %v1612_v30 = vpop.f32.mrb[8].mxu0 }
 0x3bc   : > { %v1006_v31 = vadd.f32 %v1612_v30, %v909_v28  ;;  %v1000_v32 = vpop.f32.mrb[9].mxu0 }
 0x3bd   : > { %v1001_v33 = vadd.f32 %v1000_v32, %v904_v27 }
 0x3be   : > { %v1031_v34 = vmul.f32 %v1006_v31, %v1006_v31 }
 0x3bf   : > { %v1019_v35 = vadd.f32 %v1006_v31, %v1001_v33  ;;  %v1030_v36 = vmul.f32 %v1001_v33, %v1001_v33  ;;  %v1615_v37 = vpop.f32.mrb[10].mxu0 }
 0x3c0   : > { %v1010_v39 = vpop.f32.mrb[11].mxu0  ;;  %v1016_v41 = vadd.f32 %v1615_v37, %v919_v38 }
 0x3c1   : > { %v1034_v40 = vadd.f32 %v1031_v34, %v1030_v36  ;;  %v1011_v42 = vadd.f32 %v1010_v39, %v914_v29 }
 0x3c2   : > { %v1033_v45 = vmul.f32 %v1016_v41, %v1016_v41 }
 0x3c3   : > { %v1020_v43 = vadd.f32 %v1019_v35, %v1011_v42  ;;  %v1032_v44 = vmul.f32 %v1011_v42, %v1011_v42 }
 0x3c5   : > { %v1021_v6 = vadd.f32 %v1020_v43, %v1016_v41  ;;  %v1035_v46 = vadd.f32 %v1034_v40, %v1032_v44 }
 0x3c7   : > { %v1022_v8 = vrot.slane %v1021_v6, 4  ;;  %v1036_v7 = vadd.f32 %v1035_v46, %v1033_v45 }
 0x3c9   : > { %v1023_v48 = vadd.f32 %v1022_v8, %v1021_v6  ;;  %v1037_v49 = vrot.slane %v1036_v7, 4 }
 0x3cb   : > { %v1024_v9 = vrot.slane %v1023_v48, 2  ;;  %v1038_v50 = vadd.f32 %v1037_v49, %v1036_v7  ;;  %v1134_v49 = vld [vmem:[%s2145_s9 + $0x8] sm:$0xff] }
 0x3cd   : > { %v1025_v10 = vadd.f32 %v1024_v9, %v1023_v48  ;;  %v1039_v11 = vrot.slane %v1038_v50, 2 }
 0x3cf   : > { %v1026_v12 = vrot.slane %v1025_v10, 1  ;;  %v1040_v13 = vadd.f32 %v1039_v11, %v1038_v50  ;;  %v1223_v50 = vpop.permute.xlu1 %1222 }
 0x3d1   : > { %v1027_v52 = vadd.f32 %v1026_v12, %v1025_v10  ;;  %v1041_v53 = vrot.slane %v1040_v13, 1 }
 0x3d3   : > { %v1029_v55 = vmul.f32 0.03125, %v1027_v52  ;;  %v1042_v56 = vadd.f32 %v1041_v53, %v1040_v13  ;;  %v1228_v13 = vpop.permute.xlu1 %1227 }
 0x3d5   : > { %v1043_v57 = vmul.f32 0.03125, %v1042_v56  ;;  %v1044_v58 = vmul.f32 %v1029_v55, %v1029_v55  ;;  %v1049_v59 = vsub.f32 %v1011_v42, %v1029_v55  ;;  %v1050_v60 = vsub.f32 %v1016_v41, %v1029_v55 }
 0x3d6   : > { %v1047_v61 = vsub.f32 %v1001_v33, %v1029_v55  ;;  %v1048_v62 = vsub.f32 %v1006_v31, %v1029_v55 }
 0x3d7   : > { %v1045_v63 = vsub.f32 %v1043_v57, %v1044_v58 }
 0x3d9   : > { %v1046_v1 = vmax.f32 %v1045_v63, 0.0 }
 0x3db   : > { %v1051_v2 = vadd.f32 1e-05, %v1046_v1 }
 0x3dd   : > { %1724 = vrsqrt.f32 %v1051_v2 }
 0x3e7   : > { %v1725_v5 = vpop.eup %1724 }
 0x3e8   : > { %v1055_v15 = vmul.f32 %v1725_v5, %v1049_v59  ;;  %v1056_v16 = vmul.f32 %v1725_v5, %v1050_v60  ;;  %v1053_v17 = vmul.f32 %v1725_v5, %v1047_v61  ;;  %v1054_v18 = vmul.f32 %v1725_v5, %v1048_v62 }
 0x3ea   : > { %v1083_v19 = vmul.f32 %v1074_v3, %v1055_v15  ;;  %v1084_v22 = vmul.f32 %v1079_v14, %v1056_v16  ;;  %v1081_v23 = vmul.f32 %v1064_v47, %v1053_v17  ;;  %v1082_v24 = vmul.f32 %v1069_v51, %v1054_v18 }
 0x3ec   : > { %v1112_v26 = vadd.f32 %v1107_v25, %v1084_v22  ;;  %v1109_v27 = vadd.f32 %v1092_v54, %v1081_v23  ;;  %v1110_v28 = vadd.f32 %v1097_v0, %v1082_v24  ;;  %v1111_v29 = vadd.f32 %v1102_v4, %v1083_v19 }
 0x3ee   : > { %v1120_v30 = vmul.f32 0.70710677, %v1112_v26  ;;  %v1117_v31 = vmul.f32 0.70710677, %v1109_v27  ;;  %v1118_v32 = vmul.f32 0.70710677, %v1110_v28 }
 0x3ef   : > { %v1119_v33 = vmul.f32 0.70710677, %v1111_v29  ;;  %v1116_v38 = vmul.f32 0.5, %v1112_v26  ;;  %v1113_v39 = vmul.f32 0.5, %v1109_v27  ;;  %v1114_v42 = vmul.f32 0.5, %v1110_v28 }
 0x3f0   : > { %1726 = verf.f32 %v1120_v30  ;;  %v1115_v45 = vmul.f32 0.5, %v1111_v29 }
 0x3f1   : > { %1728 = verf.f32 %v1117_v31 }
 0x3f2   : > { %1730 = verf.f32 %v1118_v32 }
 0x3f3   : > { %1732 = verf.f32 %v1119_v33 }
 0x3fa   : > { %v1727_v34 = vpop.eup %1726 }
 0x3fb   : > { %v1729_v35 = vpop.eup %1728  ;;  %v1128_v36 = vadd.f32 1.0, %v1727_v34 }
 0x3fc   : > { %v1731_v37 = vpop.eup %1730  ;;  %v1125_v40 = vadd.f32 1.0, %v1729_v35 }
 0x3fd   : > { %v1733_v41 = vpop.eup %1732  ;;  %v1126_v43 = vadd.f32 1.0, %v1731_v37  ;;  %v1132_v46 = vmul.f32 %v1128_v36, %v1116_v38 }
 0x3fe   : > { %v1129_v44 = vmul.f32 %v1125_v40, %v1113_v39  ;;  %v1127_v6 = vadd.f32 1.0, %v1733_v41 }
 0x3ff   : > { %v1130_v47 = vmul.f32 %v1126_v43, %v1114_v42 }
 0x400   : > { %v1131_v8 = vmul.f32 %v1127_v6, %v1115_v45 }
 0x401   : > { %v1655_v7 = vpack.c.bf16 %v1130_v47, %v1129_v44 }
 0x402   : > { %v1659_v48 = vpack.c.bf16 %v1132_v46, %v1131_v8 }
 0x403   : > { %1656 = vmatprep.subr.bf16.mxu0 %v1655_v7 }
 0x404   : > { %1658 = vmatpush3.bf16.msra.mxu0 %v1655_v7 }
 0x405   : > { %1660 = vmatprep.subr.bf16.mxu0 %v1659_v48 }
 0x408   : > { %1662 = vmatpush3.bf16.msra.mxu0 %v1659_v48 }
 0x40b   : > { %1625 = vmatmul.mubr.msk.f32.vlgmr.msra.gmra.mrb[12].mxu0 %vm410_vm0, %v1134_v49 }
 0x4de   : > { %v1626_v9 = vpop.f32.mrb[12].mxu0 }
 0x4df   : > { %v1207_v51 = vpop.f32.mrb[13].mxu0  ;;  %v1217_v11 = vadd.f32 %v1626_v9, %v2052_v21 }
 0x4e0   : > { %v1216_v10 = vadd.f32 %v1207_v51, %v2050_v20 }
 0x4e1   : > { %v1231_v52 = vadd.f32 %v1228_v13, %v1217_v11 }
 0x4e2   : > { %v1230_v12 = vadd.f32 %v1223_v50, %v1216_v10 }
 0x4e4   : > { %1232 = vxpose.xlu1.b32.start [1/2] (short) %v1230_v12, 128 }
 0x4e8   : > { %1233 = vxpose.xlu1.b32.end [2/2] (short) %v1231_v52, 128 }
 0x564   : > { %v1248_v53 = vpop.trf.xlu1 }
 0x565   : > { %1264 = vxpose.xlu0.b32.start [1/4] (short) (narrow) %v1248_v53, 16 }
 0x568   : > { %v1249_v54 = vpop.trf.xlu1 }
 0x569   : > { %1265 = vxpose.xlu0.b32.cont [2/4] (short) (narrow) %v1249_v54, 16 }
 0x56c   : > { %v1250_v55 = vpop.trf.xlu1 }
 0x56d   : > { %1266 = vxpose.xlu0.b32.cont [3/4] (short) (narrow) %v1250_v55, 16 }
 0x570   : > { %v1251_v56 = vpop.trf.xlu1 }
 0x571   : > { %1267 = vxpose.xlu0.b32.end [4/4] (short) (narrow) %v1251_v56, 16 }
 0x574   : > { %v1252_v57 = vpop.trf.xlu1 }
 0x575   : > { %1296 = vxpose.xlu1.b32.start [1/4] (short) (narrow) %v1252_v57, 16 }
 0x578   : > { %v1253_v58 = vpop.trf.xlu1 }
 0x579   : > { %1297 = vxpose.xlu1.b32.cont [2/4] (short) (narrow) %v1253_v58, 16 }
 0x57c   : > { %v1254_v20 = vpop.trf.xlu1 }
 0x57d   : > { %1298 = vxpose.xlu1.b32.cont [3/4] (short) (narrow) %v1254_v20, 16 }
 0x580   : > { %v1255_v21 = vpop.trf.xlu1 }
 0x581   : > { %1299 = vxpose.xlu1.b32.end [4/4] (short) (narrow) %v1255_v21, 16 }
 0x584   : > { %v1256_v59 = vpop.trf.xlu1 }
 0x585   : > { %1328 = vxpose.xlu0.b32.start [1/4] (short) (narrow) %v1256_v59, 16 }
 0x588   : > { %v1257_v60 = vpop.trf.xlu1 }
 0x589   : > { %1329 = vxpose.xlu0.b32.cont [2/4] (short) (narrow) %v1257_v60, 16 }
 0x58c   : > { %v1258_v61 = vpop.trf.xlu1 }
 0x58d   : > { %1330 = vxpose.xlu0.b32.cont [3/4] (short) (narrow) %v1258_v61, 16 }
 0x590   : > { %v1259_v62 = vpop.trf.xlu1 }
 0x591   : > { %1331 = vxpose.xlu0.b32.end [4/4] (short) (narrow) %v1259_v62, 16 }
 0x594   : > { %v1260_v63 = vpop.trf.xlu1 }
 0x595   : > { %1360 = vxpose.xlu0.b32.start [1/4] (short) (narrow) %v1260_v63, 16 }
 0x598   : > { %v1261_v0 = vpop.trf.xlu1 }
 0x599   : > { %1361 = vxpose.xlu0.b32.cont [2/4] (short) (narrow) %v1261_v0, 16 }
 0x59c   : > { %v1262_v1 = vpop.trf.xlu1 }
 0x59d   : > { %1362 = vxpose.xlu0.b32.cont [3/4] (short) (narrow) %v1262_v1, 16 }
 0x5a0   : > { %v1263_v2 = vpop.trf.xlu1 }
 0x5a1   : > { %1363 = vxpose.xlu0.b32.end [4/4] (short) (narrow) %v1263_v2, 16 }
 0x5e5   : > { %v1280_v3 = vpop.trf.xlu0 }
 0x5e6   : > { %1392 = vst.msk [vmem:[%s382_s15] sm:$0xff] %vm410_vm0, %v1280_v3 }
 0x5e9   : > { %v1281_v4 = vpop.trf.xlu0 }
 0x5ea   : > { %1393 = vst.msk [vmem:[%s382_s15 + $0x8] sm:$0xff] %vm410_vm0, %v1281_v4 }
 0x5f5   : > { %v1312_v5 = vpop.trf.xlu1 }
 0x5f6   : > { %1394 = vst.msk [vmem:[%s382_s15 + $0x10] sm:$0xff] %vm410_vm0, %v1312_v5 }
 0x5f9   : > { %v1313_v14 = vpop.trf.xlu1 }
 0x5fa   : > { %1395 = vst.msk [vmem:[%s382_s15 + $0x18] sm:$0xff] %vm410_vm0, %v1313_v14 }
 0x605   : > { %v1344_v15 = vpop.trf.xlu0 }
 0x606   : > { %1396 = vst.msk [vmem:[%s382_s15 + $0x20] sm:$0xff] %vm410_vm0, %v1344_v15 }
 0x609   : > { %v1345_v16 = vpop.trf.xlu0 }
 0x60a   : > { %1397 = vst.msk [vmem:[%s382_s15 + $0x28] sm:$0xff] %vm410_vm0, %v1345_v16 }
 0x615   : > { %v1376_v17 = vpop.trf.xlu0 }
 0x616   : > { %1398 = vst.msk [vmem:[%s382_s15 + $0x30] sm:$0xff] %vm410_vm0, %v1376_v17 }
 0x619   : > { %v1377_v18 = vpop.trf.xlu0 }
 0x61a   : > { %1399 = vst.msk [vmem:[%s382_s15 + $0x38] sm:$0xff] %vm410_vm0, %v1377_v18 }
 0x61b   : > { %1747 = shalt.err (!%p1744_p3)
}
 0x61c   : > { %s1748_s13 = scalar_lea.hbm %s2090_s29, 1024  ;;  %s1752_s25 = scalar_lea.hbm %s2147_s11, 2048 }
 0x61d   : > { %p1749_p4 = scmp.ne.s32.totalorder %s2090_s29, %s1748_s13  ;;  %p1753_p9 = scmp.lt.u32.totalorder %s2090_s29, %s2147_s11 }
 0x61e   : > { %p1754_p10 = scmp.lt.u32.totalorder %s1752_s25, %s1748_s13  ;;  %p1756_p12 = scmp.lt.u32.totalorder %s1748_s13, %s2090_s29 }
 0x61f   : > { %p1750_p7 = pnand %p1749_p4, %p1900_p5 }
 0x620   : > { %p1755_p11 = por %p1754_p10, %p1753_p9 }
 0x621   : > { %p1751_p8 = pneg %p1750_p7 }
 0x622   : > { %p1757_p13 = por %p1756_p12, %p1755_p11 }
 0x624   : > { %p1758_p0 = pnand %p1757_p13, %p1751_p8 }
 0x626   : > { %1761 = shalt.err (!%p1758_p0)
}
 0x627   : > { %s1800_s21 = smov 128   ;;  %s1801_s16 = smov 8  }
 0x628   : > { %1663 = dma.vmem_to_hbm [thread:$0]  (%p1900_p5), %s2092_s22, 1024, %s2090_s29, %s2095_s30, %s1800_s21, %s1800_s21, %s1801_s16  }
 0x629 PF: > { %p1669_p1 = scmp.ge.s32.totalorder %s1796_s20, 2  ;;  %s1430_s15 = sand.u32 1, %s1784_s17  }
 0x62a   : > { %s1431_s13 = scalar_lea.sflag [#allocation3], %s1430_s15 }
 0x62b   : > { %p1666_p2 = pnand %p1669_p1, %p1904_p6 }
 0x62d   : > { %1779 = dma.done.wait (!%p1666_p2), %s1431_s13, 1024  }
 0x62e   : > { %1781 = vsyncadd (!%p1666_p2), %s1431_s13, 4294966272  ;;  %p21_p3 = scmp.ge.s32.totalorder %s1887_s23, 4   ;;  %s2150_s17 = smov %s1788_s18 }
 0x62f   : > { %s2151_s18 = smov %s1792_s19  ;;  %s2152_s19 = smov %s1898_s26 }
 0x630   : > { %s2153_s20 = smov %s1887_s23  ;;  %23 = sbr.rel (!%p21_p3) target bundleno = 3 (0x3), region = 99 }
 0x637   :  { %1436 = vsyncpa [#allocation3], 1 }
 0x638   :  { %1438 = vsyncpa [#allocation3 + $0x1], 1 }

</bundles_post_ra>
